<compile_context>
chip_gen: v5e
topology: v5e:2x2
jax: 0.10.0
libtpu: 0.0.40
codegen_flags: <defaults>
</compile_context>

<pallas_src>
import jax
import jax.numpy as jnp
from jax.experimental import pallas as pl
from jax.experimental.pallas import tpu as pltpu

LANE = 128


def _round_up(x, m):
    return (x + m - 1) // m * m


# --------------------------- kernels ---------------------------------------

def _proj1_kernel(x_ref, w1_ref, p1_ref):
    """P1_tile = X_tile @ W1  (wide->narrow projection done before aggregation)."""
    p1_ref[...] = jnp.dot(
        x_ref[...], w1_ref[...], preferred_element_type=jnp.float32
    ).astype(p1_ref.dtype)


def _agg1_proj2_kernel(a_ref, p1_ref, b1_ref, w2_ref, p2_ref):
    """H_tile = relu(A_tile @ P1 + b1);  P2_tile = H_tile @ W2."""
    h = jnp.dot(a_ref[...], p1_ref[...], preferred_element_type=jnp.float32)
    h = jnp.maximum(h + b1_ref[...], 0.0)          # bias added once per tile
    # TODO(synk): nn.Dropout(p=0.5) is identity in eval mode; training-mode
    # stochastic dropout (pltpu.prng_*) is intentionally omitted.
    p2_ref[...] = jnp.dot(
        h.astype(jnp.bfloat16), w2_ref[...], preferred_element_type=jnp.float32
    ).astype(p2_ref.dtype)


def _agg2_kernel(a_ref, p2_ref, b2_ref, o_ref):
    """out_tile = A_tile @ P2 + b2."""
    out = jnp.dot(a_ref[...], p2_ref[...], preferred_element_type=jnp.float32)
    o_ref[...] = (out + b2_ref[...]).astype(o_ref.dtype)


# --------------------------- wrappers ---------------------------------------

def preprocess_adj(a):
    """D^{-1/2}(A+I)D^{-1/2}, plain JAX glue mirroring the numpy preprocessing."""
    n = a.shape[0]
    a_hat = a + jnp.eye(n, dtype=a.dtype)
    d = jnp.sum(a_hat, axis=1)
    d_inv_sqrt = jnp.where(d > 0, 1.0 / jnp.sqrt(d), 0.0)
    return a_hat * d_inv_sqrt[:, None] * d_inv_sqrt[None, :]


def prepare_gcn_inputs(a, params, *, tile_m=256):
    """Pad + bf16-cast the static operands exactly once (hoisted out of the
    per-call path); only X changes between forward calls."""
    assert tile_m % LANE == 0, "row tile must be a multiple of 128"
    n = a.shape[0]
    d_in, hidden = params["w1"].shape
    n_cls = params["w2"].shape[1]

    n_p = _round_up(n, tile_m)
    d_in_p = _round_up(d_in, LANE)
    h_p = _round_up(hidden, LANE)     # keep at 128 (lane minimum); do not widen
    c_p = _round_up(n_cls, LANE)      # keep at 128 (lane minimum); do not widen

    a_hat = preprocess_adj(a.astype(jnp.float32))
    a_p = jnp.zeros((n_p, n_p), jnp.bfloat16).at[:n, :n].set(
        a_hat.astype(jnp.bfloat16))
    w1_p = jnp.zeros((d_in_p, h_p), jnp.bfloat16).at[:d_in, :hidden].set(
        params["w1"].astype(jnp.bfloat16))
    b1_p = jnp.zeros((1, h_p), jnp.float32).at[:, :hidden].set(
        params["b1"].reshape(1, -1).astype(jnp.float32))
    w2_p = jnp.zeros((h_p, c_p), jnp.bfloat16).at[:hidden, :n_cls].set(
        params["w2"].astype(jnp.bfloat16))
    b2_p = jnp.zeros((1, c_p), jnp.float32).at[:, :n_cls].set(
        params["b2"].reshape(1, -1).astype(jnp.float32))

    return dict(a_p=a_p, w1_p=w1_p, b1_p=b1_p, w2_p=w2_p, b2_p=b2_p,
                n=n, n_p=n_p, d_in=d_in, d_in_p=d_in_p,
                hidden=hidden, h_p=h_p, n_cls=n_cls, c_p=c_p, tile_m=tile_m)


def _compiler_params():
    # Explicit scoped-VMEM request (item #2 of the review): per-call footprint
    # at real Cora scale (n_p=2816, TM=256, double-buffered row tiles) is
    # < 8 MiB, so 32 MiB is generous headroom and within every generation's
    # physical VMEM (v5e's default scoped limit is only 16 MiB).
    return pltpu.CompilerParams(
        dimension_semantics=("parallel",),
        vmem_limit_bytes=32 * 1024 * 1024,
    )


def gcn_cora_forward(prepared, x):
    n, n_p = prepared["n"], prepared["n_p"]
    d_in, d_in_p = prepared["d_in"], prepared["d_in_p"]
    h_p, c_p = prepared["h_p"], prepared["c_p"]
    tm = prepared["tile_m"]
    grid = (n_p // tm,)

    a_p = prepared["a_p"]
    w1_p, b1_p = prepared["w1_p"], prepared["b1_p"]
    w2_p, b2_p = prepared["w2_p"], prepared["b2_p"]

    # Only X is padded/cast per call.
    x_p = jnp.zeros((n_p, d_in_p), jnp.bfloat16).at[:n, :d_in].set(
        x.astype(jnp.bfloat16))

    # ---- call 1: P1 = X @ W1  (row-parallel over node tiles) ----
    ce1 = pl.CostEstimate(
        flops=2 * n_p * d_in_p * h_p,
        transcendentals=0,
        bytes_accessed=2 * (n_p * d_in_p + d_in_p * h_p + n_p * h_p),
    )
    p1 = pl.pallas_call(
        _proj1_kernel,
        out_shape=jax.ShapeDtypeStruct((n_p, h_p), jnp.bfloat16),
        grid_spec=pltpu.PrefetchScalarGridSpec(
            num_scalar_prefetch=0,
            grid=grid,
            in_specs=[
                pl.BlockSpec((tm, d_in_p), lambda i: (i, 0)),     # X row tile
                pl.BlockSpec((d_in_p, h_p), lambda i: (0, 0)),    # W1 (invariant)
            ],
            out_specs=pl.BlockSpec((tm, h_p), lambda i: (i, 0)),
        ),
        compiler_params=_compiler_params(),
        cost_estimate=ce1,
    )(x_p, w1_p)

    # ---- call 2: H = relu(A @ P1 + b1);  P2 = H @ W2 ----
    ce2 = pl.CostEstimate(
        flops=2 * n_p * n_p * h_p + 2 * n_p * h_p * c_p,
        transcendentals=0,
        bytes_accessed=2 * (n_p * n_p + n_p * h_p + h_p * c_p + n_p * c_p)
                       + 4 * h_p,
    )
    p2 = pl.pallas_call(
        _agg1_proj2_kernel,
        out_shape=jax.ShapeDtypeStruct((n_p, c_p), jnp.bfloat16),
        grid_spec=pltpu.PrefetchScalarGridSpec(
            num_scalar_prefetch=0,
            grid=grid,
            in_specs=[
                pl.BlockSpec((tm, n_p), lambda i: (i, 0)),        # A row tile
                pl.BlockSpec((n_p, h_p), lambda i: (0, 0)),       # P1 (invariant)
                pl.BlockSpec((1, h_p), lambda i: (0, 0)),         # b1
                pl.BlockSpec((h_p, c_p), lambda i: (0, 0)),       # W2
            ],
            out_specs=pl.BlockSpec((tm, c_p), lambda i: (i, 0)),
        ),
        compiler_params=_compiler_params(),
        cost_estimate=ce2,
    )(a_p, p1, b1_p, w2_p)

    # ---- call 3: out = A @ P2 + b2 ----
    ce3 = pl.CostEstimate(
        flops=2 * n_p * n_p * c_p,
        transcendentals=0,
        bytes_accessed=2 * (n_p * n_p + n_p * c_p) + 4 * (n_p * c_p + c_p),
    )
    out_p = pl.pallas_call(
        _agg2_kernel,
        out_shape=jax.ShapeDtypeStruct((n_p, c_p), jnp.float32),
        grid_spec=pltpu.PrefetchScalarGridSpec(
            num_scalar_prefetch=0,
            grid=grid,
            in_specs=[
                pl.BlockSpec((tm, n_p), lambda i: (i, 0)),        # A row tile
                pl.BlockSpec((n_p, c_p), lambda i: (0, 0)),       # P2 (invariant)
                pl.BlockSpec((1, c_p), lambda i: (0, 0)),         # b2
            ],
            out_specs=pl.BlockSpec((tm, c_p), lambda i: (i, 0)),
        ),
        compiler_params=_compiler_params(),
        cost_estimate=ce3,
    )(a_p, p2, b2_p)

    return out_p[:n, :prepared["n_cls"]]


def init_params(key, input_dim=1433, hidden_dim=16, num_classes=7):
    k1, k2, k3, k4 = jax.random.split(key, 4)
    # nn.Linear default init: U(-1/sqrt(fan_in), 1/sqrt(fan_in)); weights stored
    # transposed (in_dim, out_dim) for the kernel.
    bound1 = 1.0 / jnp.sqrt(jnp.float32(input_dim))
    bound2 = 1.0 / jnp.sqrt(jnp.float32(hidden_dim))
    return {
        "w1": jax.random.uniform(k1, (input_dim, hidden_dim), jnp.float32,
                                 -bound1, bound1),
        "b1": jax.random.uniform(k2, (1, hidden_dim), jnp.float32,
                                 -bound1, bound1),
        "w2": jax.random.uniform(k3, (hidden_dim, num_classes), jnp.float32,
                                 -bound2, bound2),
        "b2": jax.random.uniform(k4, (1, num_classes), jnp.float32,
                                 -bound2, bound2),
    }


if __name__ == "__main__":
    key = jax.random.PRNGKey(0)
    k_a, k_x, k_p = jax.random.split(key, 3)

    # Small graph: 256 nodes, module-defined feature/hidden/class dims.
    N = 256
    INPUT_DIM = 1433
    HIDDEN_DIM = 16
    NUM_CLASSES = 7
    TILE_M = 128          # grid=(2,) so the row-parallel axis is exercised

    # Symmetric random 0/1 adjacency with no self loops.
    upper = (jax.random.uniform(k_a, (N, N)) < 0.05).astype(jnp.float32)
    upper = jnp.triu(upper, k=1)
    adj = upper + upper.T

    x = jax.random.normal(k_x, (N, INPUT_DIM), dtype=jnp.float32)
    params = init_params(k_p, INPUT_DIM, HIDDEN_DIM, NUM_CLASSES)

    # Static operands padded/cast exactly once, reused across forward calls.
    prepared = prepare_gcn_inputs(adj, params, tile_m=TILE_M)

    out = gcn_cora_forward(prepared, x)
    out = jax.block_until_ready(out)

    assert out.shape == (N, NUM_CLASSES)
    assert out.dtype == jnp.float32

    # Pure-JAX f32 reference (kernel uses bf16 MXU operands with f32
    # accumulation, so a slightly looser tolerance is used).
    a_hat = preprocess_adj(adj)
    ref_h = jnp.maximum(a_hat @ x @ params["w1"] + params["b1"], 0.0)
    ref = a_hat @ ref_h @ params["w2"] + params["b2"]
    max_err = jnp.max(jnp.abs(out - ref))
    assert jnp.allclose(out, ref, atol=5e-2, rtol=5e-2), float(max_err)

    print("KERNEL_OK")
</pallas_src>

<mosaic_0001>
module attributes {stable_mosaic.version = 11 : i64} {
  func.func @_proj1_kernel(%arg0: i32, %arg1: memref<128x1536xbf16, #tpu.memory_space<vmem>>, %arg2: memref<1536x128xbf16, #tpu.memory_space<vmem>>, %arg3: memref<128x128xbf16, #tpu.memory_space<vmem>>) attributes {dimension_semantics = [#tpu.dimension_semantics<parallel>], iteration_bounds = array<i64: 2>, scalar_prefetch = 0 : i64, scratch_operands = 0 : i64, tpu.core_type = #tpu.core_type<tc>, window_params = [{transform_indices = @transform_0, window_bounds = array<i64: 128, 1536>}, {pipeline_mode = #tpu.pipeline_mode<synchronous>, transform_indices = @transform_1, window_bounds = array<i64: 1536, 128>}, {transform_indices = @transform_2, window_bounds = array<i64: 128, 128>}]} {
    %c0 = arith.constant 0 : index
    %c0_0 = arith.constant 0 : index
    %0 = vector.load %arg1[%c0, %c0_0] : memref<128x1536xbf16, #tpu.memory_space<vmem>>, vector<128x1536xbf16>
    %c0_1 = arith.constant 0 : index
    %c0_2 = arith.constant 0 : index
    %1 = vector.load %arg2[%c0_1, %c0_2] : memref<1536x128xbf16, #tpu.memory_space<vmem>>, vector<1536x128xbf16>
    %cst = arith.constant dense<0.000000e+00> : vector<128x128xf32>
    %2 = tpu.matmul %0, %1, %cst {dimension_numbers = #tpu.dot_dimension_numbers<[1], [0], [0], [1], [0, 0, 1, 1], [], []>} : vector<128x1536xbf16>, vector<1536x128xbf16>, vector<128x128xf32> -> vector<128x128xf32>
    %3 = arith.truncf %2 : vector<128x128xf32> to vector<128x128xbf16>
    %c0_3 = arith.constant 0 : index
    %c0_4 = arith.constant 0 : index
    %4 = vector.load %arg3[%c0_3, %c0_4] : memref<128x128xbf16, #tpu.memory_space<vmem>>, vector<128x128xbf16>
    tpu.vector_store %arg3[%c0_3, %c0_4], %3 {strides = array<i32>} : memref<128x128xbf16, #tpu.memory_space<vmem>>, vector<128x128xbf16>,
    return
  }
  func.func @transform_0(%arg0: i32) -> (i32, i32) {
    %c0_i32 = arith.constant 0 : i32
    %c0_i32_0 = arith.constant 0 : i32
    return %arg0, %c0_i32 : i32, i32
  }
  func.func @transform_1(%arg0: i32) -> (i32, i32) {
    %c0_i32 = arith.constant 0 : i32
    %c0_i32_0 = arith.constant 0 : i32
    %c0_i32_1 = arith.constant 0 : i32
    return %c0_i32, %c0_i32_0 : i32, i32
  }
  func.func @transform_2(%arg0: i32) -> (i32, i32) {
    %c0_i32 = arith.constant 0 : i32
    %c0_i32_0 = arith.constant 0 : i32
    return %arg0, %c0_i32 : i32, i32
  }
}

</mosaic_0001>

<bundles_post_ra>
// kernel: tpu_custom_call.1
= control target key start
LH: loop header
LB: loop body
LE: loop exit
PB: predicated region body
PF: predicated region fallthrough
CT: control target
= control target key end

     0   :  { %7 = vsyncpa [#allocation3], 0  ;;  %s3930_s0 = inlined_call_operand.hbm [shape: bf16[256,1536], index: 0, kind: input, shape index: {}]   ;;  %s3931_s1 = inlined_call_operand.hbm [shape: bf16[1536,128], index: 1, kind: input, shape index: {}]   ;;  %s3932_s2 = inlined_call_operand.hbm [shape: bf16[256,128], index: 2, kind: output, shape index: {}]  }
   0x1   :  { %9 = vsyncpa [#allocation3 + $0x1], 0 }
   0x2   :  { %10 = vsyncpa [#allocation6], 0 }
   0x3   :  { %11 = vsyncpa [#allocation4], 0 }
   0x4   :  { %13 = vsyncpa [#allocation4 + $0x1], 0  ;;  %s3490_s9 = smov 0   ;;  %s3492_s10 = smov 0  }
   0x5   :  { %s3494_s11 = smov 0   ;;  %s3496_s12 = smov 0  }
   0x6 LB: > { %s3511_s13 = sadd.s32 4294967295, %s3466_s12   ;;  %s2247_s14 = sadd.s32 4294967294, %s3466_s12   ;;  %s3466_s12 = sphi %s3496_s12, %s3942_s12   ;;  %s3462_s11 = sphi %s3494_s11, %s3941_s11   ;;  %s3458_s10 = sphi %s3492_s10, %s3940_s10   ;;  %s3454_s9 = sphi %s3490_s9, %s3939_s9  }
   0x7   : > { %p39_p0 = scmp.ne.s32.totalorder %s3458_s10, %s3454_s9  ;;  %p40_p1 = scmp.eq.s32.totalorder %s3511_s13, 0 }
   0x8   : > { %p84_p2 = scmp.eq.s32.totalorder %s3511_s13, 1  ;;  %p90_p3 = scmp.eq.s32.totalorder %s2247_s14, 1 }
   0x9   : > { %p3520_p4 = por %p40_p1, %p39_p0  ;;  %p2248_p5 = scmp.ge.s32.totalorder %s3466_s12, 1 }
   0xa   : > { %p3525_p6 = por %p90_p3, %p39_p0  ;;  %p97_p7 = scmp.lt.s32.totalorder %s3466_s12, 3 }
   0xb   : > { %s108_s19 = sshll.u32 %s3931_s1, 4  ;;  %s3468_s21 = smov [#allocation5]   ;;  %s109_s19 = int_to_ptr.hbm [resolvable:$true] %s108_s19 }
   0xc   : > { %p3533_p8 = pnand %p2248_p5, %p97_p7  ;;  %s110_s22 = sshll.u32 %s3468_s21, 4  ;;  %s111_s22 = int_to_ptr.vmem [resolvable:$true] %s110_s22 }
   0xd   : > { %s3543_s23 = sadd.s32 1, %s3466_s12   ;;  %s3469_s24 = smov 64  }
   0xe   : > { %p3281_p9 = pneg %p3533_p8  ;;  %s3470_s25 = smov 4  }
   0xf   : > { %s23_s26 = ssub.s32 %s3466_s12, %s3543_s23  ;;  %s26_s27 = sadd.s32 1, %s3462_s11 }
  0x10   : > { %p3282_p10 = pnand %p3281_p9, %p40_p1  ;;  %p24_p12 = scmp.eq.s32.totalorder %s23_s26, 0 }
  0x11   : > { %p33_p13 = scmp.ne.s32.totalorder %s3462_s11, %s3458_s10  ;;  %p34_p0 = scmp.eq.s32.totalorder %s3466_s12, 0 }
  0x12   : > { %3284 = dma.hbm_to_vmem [thread:$0]  (!%p3282_p10), %s109_s19, 12288, %s111_s22, [#allocation6], %s3469_s24, %s3469_s24, %s3470_s25  }
  0x13   : > { %p3294_p3 = scmp.lt.s32.totalorder %s3466_s12, 2  ;;  %p35_p5 = por %p34_p0, %p33_p13 }
  0x14   : > { %s3553_s28 = scalar_select %p24_p12, %s3462_s11, %s26_s27  }
  0x15   : > { %p3557_p7 = por %p84_p2, %p33_p13  ;;  %s124_s30 = sand.u32 1, %s3462_s11  }
  0x16   : > { %s3271_s3 = smul.u32 768, %s3466_s12  ;;  %p3566_p9 = pnand %p3294_p3, %p35_p5 }
  0x17   : > { %s3270_s4 = smul.u32 768, %s124_s30  ;;  %s125_s19 = scalar_lea.sflag [#allocation3], %s124_s30 }
  0x18   : > { %s134_s7 = scalar_lea.hbm %s3930_s0, %s3271_s3  ;;  %p3370_p10 = pneg %p3566_p9 }
  0x19   : > { %s135_s14 = sshll.u32 %s134_s7, 4  ;;  %s128_s17 = scalar_lea.vmem [#allocation2], %s3270_s4  ;;  %s136_s14 = int_to_ptr.hbm [resolvable:$true] %s135_s14 }
  0x1a   : > { %s137_s18 = sshll.u32 %s128_s17, 4  ;;  %s3366_s21 = sshra.s32 %s136_s14, 4  ;;  %s138_s18 = int_to_ptr.vmem [resolvable:$true] %s137_s18  ;;  %s3367_s21 = int_to_ptr.hbm [resolvable:$true] %s3366_s21 }
  0x1b   : > { %s3368_s22 = scalar_lea.hbm %s3367_s21, 768  ;;  %s3373_s26 = scalar_lea.hbm %s3930_s0, 1536 }
  0x1c   : > { %p3369_p2 = scmp.ne.s32.totalorder %s3367_s21, %s3368_s22  ;;  %p3374_p0 = scmp.lt.s32.totalorder %s3367_s21, %s3930_s0 }
  0x1d   : > { %p3375_p3 = scmp.lt.s32.totalorder %s3373_s26, %s3368_s22 }
  0x1e   : > { %p3371_p12 = pnand %p3370_p10, %p3369_p2 }
  0x1f   : > { %p3376_p5 = por %p3375_p3, %p3374_p0 }
  0x20   : > { %p3372_p13 = pneg %p3371_p12 }
  0x22   : > { %p3377_p11 = pnand %p3376_p5, %p3372_p13 }
  0x24   : > { %3380 = shalt.err (!%p3377_p11)
}
  0x25   : > { %s3471_s30 = smov 768   ;;  %s3472_s4 = smov 48  }
  0x26   : > { %3288 = dma.hbm_to_vmem [thread:$0]  (!%p3566_p9), %s136_s14, 12288, %s138_s18, %s125_s19, %s3471_s30, %s3471_s30, %s3472_s4  }
  0x27   : > { %149 = sbr.rel (%p3533_p8) target bundleno = 599 (0x257), region = 28  ;;  %s3583_s5 = sand.u32 (!%p3533_p8), 1, %s3458_s10  }
  0x28   : > { %s3272_s6 = smul.u32 (!%p3533_p8), 768, %s3583_s5  ;;  %s152_s7 = scalar_lea.sflag (!%p3533_p8), [#allocation3], %s3583_s5 }
  0x2a   : > { %s3587_s17 = scalar_lea.vmem (!%p3533_p8), [#allocation2], %s3272_s6 }
  0x2c   : > { %3441 = dma.done.wait (%p3520_p4), %s152_s7, 12288  }
  0x2d   : > { %3443 = vsyncadd (%p3520_p4), %s152_s7, 4294955008 }
  0x2e   : > { %3445 = dma.done.wait (%p40_p1), [#allocation6], 12288  }
  0x2f   : > { %3447 = vsyncadd (%p40_p1), [#allocation6], 4294955008  ;;  %v3133_v0 = vld [vmem:[#allocation5 + $0x38] sm:$0xff]  ;;  %v3132_v4 = vld [vmem:[#allocation5 + $0x30] sm:$0xff]  ;;  %s2256_s15 = sshll.u32 %s3583_s5, 6  ;;  %s3222_s8 = sshll.u32 %s3511_s13, 6 }
  0x30   : > { %v3141_v1 = vld [vmem:[#allocation5 + $0x78] sm:$0xff]  ;;  %1528 = vmatpush.bf16.msra.mxu0 %v3133_v0  ;;  %v3140_v5 = vld [vmem:[#allocation5 + $0x70] sm:$0xff]  ;;  %v3131_v8 = vld [vmem:[#allocation5 + $0x28] sm:$0xff]  ;;  %s3872_s20 = scalar_lea.vmem [#allocation7], %s2256_s15  ;;  %s2160_s19 = scalar_lea.hbm %s3932_s2, %s3222_s8 }
  0x31   : > { %v3149_v2 = vld [vmem:[#allocation5 + $0xb8] sm:$0xff]  ;;  %1577 = vmatpush.bf16.msra.mxu1 %v3141_v1  ;;  %v3148_v6 = vld [vmem:[#allocation5 + $0xb0] sm:$0xff]  ;;  %v3139_v9 = vld [vmem:[#allocation5 + $0x68] sm:$0xff]  ;;  %s2161_s21 = sshll.u32 %s3872_s20, 4  ;;  %s2163_s22 = sshll.u32 %s2160_s19, 4  ;;  %s2162_s21 = int_to_ptr.vmem [resolvable:$true] %s2161_s21  ;;  %s2164_s22 = int_to_ptr.hbm [resolvable:$true] %s2163_s22 }
  0x32   : > { %v3157_v3 = vld [vmem:[#allocation5 + $0xf8] sm:$0xff]  ;;  %1626 = vmatpush.bf16.msra.mxu2 %v3149_v2  ;;  %v3156_v7 = vld [vmem:[#allocation5 + $0xf0] sm:$0xff]  ;;  %v3147_v10 = vld [vmem:[#allocation5 + $0xa8] sm:$0xff]  ;;  %s2149_s13 = scalar_lea.sflag [#allocation4], %s3583_s5  ;;  %s3410_s24 = sshra.s32 %s2164_s22, 4  ;;  %s3411_s24 = int_to_ptr.hbm [resolvable:$true] %s3410_s24 }
  0x33   : > { %1675 = vmatpush.bf16.msra.mxu3 %v3157_v3  ;;  %v3155_v11 = vld [vmem:[#allocation5 + $0xe8] sm:$0xff]  ;;  %v3130_v12 = vld [vmem:[#allocation5 + $0x20] sm:$0xff]  ;;  %v3129_v16 = vld [vmem:[#allocation5 + $0x18] sm:$0xff]  ;;  %s3412_s25 = scalar_lea.hbm %s3411_s24, 64  ;;  %s3416_s3 = scalar_lea.hbm %s3932_s2, 128 }
  0x34   : > { %1529 = vmatpush.bf16.msra.mxu0 %v3132_v4  ;;  %v3138_v13 = vld [vmem:[#allocation5 + $0x60] sm:$0xff]  ;;  %v3137_v17 = vld [vmem:[#allocation5 + $0x58] sm:$0xff]  ;;  %v3128_v20 = vld [vmem:[#allocation5 + $0x10] sm:$0xff]  ;;  %p3413_p1 = scmp.ne.s32.totalorder %s3411_s24, %s3412_s25  ;;  %p3417_p11 = scmp.lt.s32.totalorder %s3411_s24, %s3932_s2 }
  0x35   : > { %1578 = vmatpush.bf16.msra.mxu1 %v3140_v5  ;;  %v3146_v14 = vld [vmem:[#allocation5 + $0xa0] sm:$0xff]  ;;  %v3145_v18 = vld [vmem:[#allocation5 + $0x98] sm:$0xff]  ;;  %v3136_v21 = vld [vmem:[#allocation5 + $0x50] sm:$0xff]  ;;  %p3418_p9 = scmp.lt.s32.totalorder %s3416_s3, %s3412_s25 }
  0x36   : > { %1627 = vmatpush.bf16.msra.mxu2 %v3148_v6  ;;  %v3154_v15 = vld [vmem:[#allocation5 + $0xe0] sm:$0xff]  ;;  %v3153_v19 = vld [vmem:[#allocation5 + $0xd8] sm:$0xff]  ;;  %v3144_v22 = vld [vmem:[#allocation5 + $0x90] sm:$0xff]  ;;  %p3414_p4 = pnand %p3413_p1, %p3557_p7 }
  0x37   : > { %1676 = vmatpush.bf16.msra.mxu3 %v3156_v7  ;;  %v3152_v23 = vld [vmem:[#allocation5 + $0xd0] sm:$0xff]  ;;  %v3127_v24 = vld [vmem:[#allocation5 + $0x8] sm:$0xff]  ;;  %v3126_v28 = vld [vmem:[#allocation5] sm:$0xff]  ;;  %p3419_p2 = por %p3418_p9, %p3417_p11 }
  0x38   : > { %1530 = vmatpush.bf16.msra.mxu0 %v3131_v8  ;;  %v3135_v25 = vld [vmem:[#allocation5 + $0x48] sm:$0xff]  ;;  %v3134_v29 = vld [vmem:[#allocation5 + $0x40] sm:$0xff]  ;;  %v3036_v33 = vld [vmem:[%s3587_s17 + $0x2c] sm:$0xf0]  ;;  %p3415_p8 = pneg %p3414_p4 }
  0x39   : > { %1579 = vmatpush.bf16.msra.mxu1 %v3139_v9  ;;  %v3143_v26 = vld [vmem:[#allocation5 + $0x88] sm:$0xff]  ;;  %v3142_v30 = vld [vmem:[#allocation5 + $0x80] sm:$0xff]  ;;  %v2261_v35 = vld [vmem:[%s3587_s17 + $0x30] sm:$0xf0] }
  0x3a   : > { %1628 = vmatpush.bf16.msra.mxu2 %v3147_v10  ;;  %v3151_v27 = vld [vmem:[#allocation5 + $0xc8] sm:$0xff]  ;;  %v3150_v31 = vld [vmem:[#allocation5 + $0xc0] sm:$0xff]  ;;  %v3037_v37 = vld [vmem:[%s3587_s17 + $0x34] sm:$0xf0]  ;;  %p3420_p10 = pnand %p3419_p2, %p3415_p8 }
  0x3b   : > { %1677 = vmatpush.bf16.msra.mxu3 %v3155_v11  ;;  %v2259_v32 = vld [vmem:[%s3587_s17] sm:$0xf]  ;;  %v3030_v34 = vld [vmem:[%s3587_s17 + $0x4] sm:$0xf]  ;;  %v2267_v36 = vld [vmem:[%s3587_s17 + $0x8] sm:$0xf] }
  0x3c   : > { %1531 = vmatpush.bf16.msra.mxu0 %v3130_v12  ;;  %v3031_v38 = vld [vmem:[%s3587_s17 + $0xc] sm:$0xf]  ;;  %v2269_v39 = vld [vmem:[%s3587_s17 + $0x38] sm:$0xf0]  ;;  %v2260_v42 = vor.u32 %v3036_v33, %v2259_v32  ;;  %v2264_v43 = vor.u32 %v3030_v34, %v2261_v35  ;;  %v2268_v44 = vor.u32 %v3037_v37, %v2267_v36  ;;  %v3180_v48 = vld [vmem:[#allocation5 + $0x1b0] sm:$0xff] }
  0x3d   : > { %1580 = vmatpush.bf16.msra.mxu1 %v3138_v13  ;;  %v3181_v40 = vld [vmem:[#allocation5 + $0x1b8] sm:$0xff]  ;;  %v2272_v45 = vor.u32 %v3031_v38, %v2269_v39  ;;  %v3164_v49 = vld [vmem:[#allocation5 + $0x130] sm:$0xff]  ;;  %v3179_v52 = vld [vmem:[#allocation5 + $0x1a8] sm:$0xff] }
  0x3e   : > { %1629 = vmatpush.bf16.msra.mxu2 %v3146_v14  ;;  %v3165_v41 = vld [vmem:[#allocation5 + $0x138] sm:$0xff]  ;;  %v3188_v50 = vld [vmem:[#allocation5 + $0x1f0] sm:$0xff]  ;;  %v3163_v53 = vld [vmem:[#allocation5 + $0x128] sm:$0xff] }
  0x3f   : > { %1678 = vmatpush.bf16.msra.mxu3 %v3154_v15  ;;  %v3189_v46 = vld [vmem:[#allocation5 + $0x1f8] sm:$0xff]  ;;  %v3172_v51 = vld [vmem:[#allocation5 + $0x170] sm:$0xff]  ;;  %v3187_v54 = vld [vmem:[#allocation5 + $0x1e8] sm:$0xff] }
  0x40   : > { %1532 = vmatpush.bf16.msra.mxu0 %v3129_v16  ;;  %v3173_v47 = vld [vmem:[#allocation5 + $0x178] sm:$0xff]  ;;  %v3171_v55 = vld [vmem:[#allocation5 + $0x168] sm:$0xff]  ;;  %v2307_v56 = vld [vmem:[%s3587_s17 + $0x60] sm:$0xf] }
  0x41   : > { %1581 = vmatpush.bf16.msra.mxu1 %v3137_v17  ;;  %v3048_v57 = vld [vmem:[%s3587_s17 + $0x8c] sm:$0xf0]  ;;  %v3042_v58 = vld [vmem:[%s3587_s17 + $0x64] sm:$0xf]  ;;  %v2309_v59 = vld [vmem:[%s3587_s17 + $0x90] sm:$0xf0] }
  0x42   : > { %1630 = vmatpush.bf16.msra.mxu2 %v3145_v18  ;;  %v2315_v60 = vld [vmem:[%s3587_s17 + $0x68] sm:$0xf]  ;;  %v3049_v61 = vld [vmem:[%s3587_s17 + $0x94] sm:$0xf0]  ;;  %v3043_v62 = vld [vmem:[%s3587_s17 + $0x6c] sm:$0xf]  ;;  %v2308_v0 = vor.u32 %v3048_v57, %v2307_v56  ;;  %v2312_v1 = vor.u32 %v3042_v58, %v2309_v59 }
  0x43   : > { %1679 = vmatpush.bf16.msra.mxu3 %v3153_v19  ;;  %v2317_v63 = vld [vmem:[%s3587_s17 + $0x98] sm:$0xf0]  ;;  %v2316_v2 = vor.u32 %v3049_v61, %v2315_v60  ;;  %v3178_v4 = vld [vmem:[#allocation5 + $0x1a0] sm:$0xff]  ;;  %v3060_v9 = vld [vmem:[%s3587_s17 + $0xec] sm:$0xf0] }
  0x44   : > { %1533 = vmatpush.bf16.msra.mxu0 %v3128_v20  ;;  %v2320_v3 = vor.u32 %v3043_v62, %v2317_v63  ;;  %v3162_v5 = vld [vmem:[#allocation5 + $0x120] sm:$0xff]  ;;  %v2357_v11 = vld [vmem:[%s3587_s17 + $0xf0] sm:$0xf0]  ;;  %v2363_v12 = vld [vmem:[%s3587_s17 + $0xc8] sm:$0xf] }
  0x45   : > { %1582 = vmatpush.bf16.msra.mxu1 %v3136_v21  ;;  %v3186_v6 = vld [vmem:[#allocation5 + $0x1e0] sm:$0xff]  ;;  %v3061_v13 = vld [vmem:[%s3587_s17 + $0xf4] sm:$0xf0]  ;;  %v3055_v14 = vld [vmem:[%s3587_s17 + $0xcc] sm:$0xf] }
  0x46   : > { %1631 = vmatpush.bf16.msra.mxu2 %v3144_v22  ;;  %v3170_v7 = vld [vmem:[#allocation5 + $0x160] sm:$0xff]  ;;  %v2365_v15 = vld [vmem:[%s3587_s17 + $0xf8] sm:$0xf0]  ;;  %v2364_v18 = vor.u32 %v3061_v13, %v2363_v12  ;;  %v3176_v36 = vld [vmem:[#allocation5 + $0x190] sm:$0xff] }
  0x47   : > { %1680 = vmatpush.bf16.msra.mxu3 %v3152_v23  ;;  %v2355_v8 = vld [vmem:[%s3587_s17 + $0xc0] sm:$0xf]  ;;  %v3054_v10 = vld [vmem:[%s3587_s17 + $0xc4] sm:$0xf]  ;;  %v2368_v19 = vor.u32 %v3055_v14, %v2365_v15  ;;  %v3177_v20 = vld [vmem:[#allocation5 + $0x198] sm:$0xff] }
  0x48   : > { %1534 = vmatpush.bf16.msra.mxu0 %v3127_v24  ;;  %v2356_v16 = vor.u32 %v3060_v9, %v2355_v8  ;;  %v2360_v17 = vor.u32 %v3054_v10, %v2357_v11  ;;  %v3161_v21 = vld [vmem:[#allocation5 + $0x118] sm:$0xff]  ;;  %v2403_v24 = vld [vmem:[%s3587_s17 + $0x120] sm:$0xf]  ;;  %v3160_v37 = vld [vmem:[#allocation5 + $0x110] sm:$0xff] }
  0x49   : > { %1583 = vmatpush.bf16.msra.mxu1 %v3135_v25  ;;  %v3185_v22 = vld [vmem:[#allocation5 + $0x1d8] sm:$0xff]  ;;  %v3072_v25 = vld [vmem:[%s3587_s17 + $0x14c] sm:$0xf0]  ;;  %v2499_v56 = vld [vmem:[%s3587_s17 + $0x1e0] sm:$0xf] }
  0x4a   : > { %1632 = vmatpush.bf16.msra.mxu2 %v3143_v26  ;;  %v3169_v23 = vld [vmem:[#allocation5 + $0x158] sm:$0xff]  ;;  %v3066_v26 = vld [vmem:[%s3587_s17 + $0x124] sm:$0xf]  ;;  %v2404_v32 = vor.u32 %v3072_v25, %v2403_v24  ;;  %v3184_v38 = vld [vmem:[#allocation5 + $0x1d0] sm:$0xff] }
  0x4b   : > { %1681 = vmatpush.bf16.msra.mxu3 %v3151_v27  ;;  %v2405_v27 = vld [vmem:[%s3587_s17 + $0x150] sm:$0xf0]  ;;  %v3096_v57 = vld [vmem:[%s3587_s17 + $0x20c] sm:$0xf0]  ;;  %v3090_v58 = vld [vmem:[%s3587_s17 + $0x1e4] sm:$0xf] }
  0x4c   : > { %1535 = vmatpush.bf16.msra.mxu0 %v3126_v28  ;;  %v2411_v28 = vld [vmem:[%s3587_s17 + $0x128] sm:$0xf]  ;;  %v2408_v33 = vor.u32 %v3066_v26, %v2405_v27  ;;  %v3168_v39 = vld [vmem:[#allocation5 + $0x150] sm:$0xff]  ;;  %v3097_v61 = vld [vmem:[%s3587_s17 + $0x214] sm:$0xf0] }
  0x4d   : > { %1584 = vmatpush.bf16.msra.mxu1 %v3134_v29  ;;  %v3073_v29 = vld [vmem:[%s3587_s17 + $0x154] sm:$0xf0]  ;;  %v2501_v59 = vld [vmem:[%s3587_s17 + $0x210] sm:$0xf0]  ;;  %v2507_v60 = vld [vmem:[%s3587_s17 + $0x1e8] sm:$0xf] }
  0x4e   : > { %1633 = vmatpush.bf16.msra.mxu2 %v3142_v30  ;;  %v3067_v30 = vld [vmem:[%s3587_s17 + $0x12c] sm:$0xf]  ;;  %v2412_v34 = vor.u32 %v3073_v29, %v2411_v28  ;;  %v2509_v63 = vld [vmem:[%s3587_s17 + $0x218] sm:$0xf0]  ;;  %v2547_v8 = vld [vmem:[%s3587_s17 + $0x240] sm:$0xf] }
  0x4f   : > { %1682 = vmatpush.bf16.msra.mxu3 %v3150_v31  ;;  %1536 = vmatmul.bf16.vlgmr.msra.gmra.mxu0 %v2260_v42  ;;  %v2413_v31 = vld [vmem:[%s3587_s17 + $0x158] sm:$0xf0]  ;;  %v3078_v42 = vld [vmem:[%s3587_s17 + $0x184] sm:$0xf]  ;;  %v3091_v62 = vld [vmem:[%s3587_s17 + $0x1ec] sm:$0xf] }
  0x50   : > { %1724 = vmatpush.bf16.msrb.mxu0 %v3165_v41  ;;  %1585 = vmatmul.bf16.vlgmr.msra.gmra.mxu1 %v2264_v43  ;;  %v2416_v35 = vor.u32 %v3067_v30, %v2413_v31  ;;  %v3084_v41 = vld [vmem:[%s3587_s17 + $0x1ac] sm:$0xf0]  ;;  %v2453_v43 = vld [vmem:[%s3587_s17 + $0x1b0] sm:$0xf0]  ;;  %v3102_v10 = vld [vmem:[%s3587_s17 + $0x244] sm:$0xf] }
  0x51   : > { %1634 = vmatmul.bf16.vlgmr.msra.gmra.mxu2 %v2268_v44  ;;  %1773 = vmatpush.bf16.msrb.mxu1 %v3173_v47  ;;  %v2459_v44 = vld [vmem:[%s3587_s17 + $0x188] sm:$0xf]  ;;  %v2461_v47 = vld [vmem:[%s3587_s17 + $0x1b8] sm:$0xf0]  ;;  %v3108_v9 = vld [vmem:[%s3587_s17 + $0x26c] sm:$0xf0] }
  0x52   : > { %1822 = vmatpush.bf16.msrb.mxu2 %v3181_v40  ;;  %1683 = vmatmul.bf16.vlgmr.msra.gmra.mxu3 %v2272_v45  ;;  %v2451_v40 = vld [vmem:[%s3587_s17 + $0x180] sm:$0xf]  ;;  %v3085_v45 = vld [vmem:[%s3587_s17 + $0x1b4] sm:$0xf0]  ;;  %v2549_v11 = vld [vmem:[%s3587_s17 + $0x270] sm:$0xf0] }
  0x53   : > { %1871 = vmatpush.bf16.msrb.mxu3 %v3189_v46  ;;  %v3079_v46 = vld [vmem:[%s3587_s17 + $0x18c] sm:$0xf]  ;;  %v2555_v12 = vld [vmem:[%s3587_s17 + $0x248] sm:$0xf]  ;;  %v3109_v13 = vld [vmem:[%s3587_s17 + $0x274] sm:$0xf0] }
  0x54   : > { %1725 = vmatpush.bf16.msrb.mxu0 %v3164_v49  ;;  %v2456_v49 = vor.u32 %v3078_v42, %v2453_v43  ;;  %v3103_v14 = vld [vmem:[%s3587_s17 + $0x24c] sm:$0xf]  ;;  %v2557_v15 = vld [vmem:[%s3587_s17 + $0x278] sm:$0xf0]  ;;  %v2595_v24 = vld [vmem:[%s3587_s17 + $0x2a0] sm:$0xf] }
  0x55   : > { %1774 = vmatpush.bf16.msrb.mxu1 %v3172_v51  ;;  %v2464_v51 = vor.u32 %v3079_v46, %v2461_v47  ;;  %v3120_v25 = vld [vmem:[%s3587_s17 + $0x2cc] sm:$0xf0]  ;;  %v3114_v26 = vld [vmem:[%s3587_s17 + $0x2a4] sm:$0xf]  ;;  %v2597_v27 = vld [vmem:[%s3587_s17 + $0x2d0] sm:$0xf0] }
  0x56   : > { %1823 = vmatpush.bf16.msrb.mxu2 %v3180_v48  ;;  %v2452_v48 = vor.u32 %v3084_v41, %v2451_v40  ;;  %v2603_v28 = vld [vmem:[%s3587_s17 + $0x2a8] sm:$0xf]  ;;  %v3121_v29 = vld [vmem:[%s3587_s17 + $0x2d4] sm:$0xf0]  ;;  %v3115_v30 = vld [vmem:[%s3587_s17 + $0x2ac] sm:$0xf] }
  0x57   : > { %1872 = vmatpush.bf16.msrb.mxu3 %v3188_v50  ;;  %v2460_v50 = vor.u32 %v3085_v45, %v2459_v44  ;;  %v2605_v31 = vld [vmem:[%s3587_s17 + $0x2d8] sm:$0xf0]  ;;  %v2275_v40 = vld [vmem:[%s3587_s17 + $0x10] sm:$0xf]  ;;  %v3038_v41 = vld [vmem:[%s3587_s17 + $0x3c] sm:$0xf0] }
  0x58   : > { %1726 = vmatpush.bf16.msrb.mxu0 %v3163_v53  ;;  %v3159_v53 = vld [vmem:[#allocation5 + $0x108] sm:$0xff]  ;;  %v3032_v42 = vld [vmem:[%s3587_s17 + $0x14] sm:$0xf]  ;;  %v2277_v43 = vld [vmem:[%s3587_s17 + $0x40] sm:$0xf0] }
  0x59   : > { %1775 = vmatpush.bf16.msrb.mxu1 %v3171_v55  ;;  %v3167_v55 = vld [vmem:[#allocation5 + $0x148] sm:$0xff]  ;;  %v2283_v44 = vld [vmem:[%s3587_s17 + $0x18] sm:$0xf]  ;;  %v3033_v46 = vld [vmem:[%s3587_s17 + $0x1c] sm:$0xf] }
  0x5a   : > { %1824 = vmatpush.bf16.msrb.mxu2 %v3179_v52  ;;  %v3175_v52 = vld [vmem:[#allocation5 + $0x188] sm:$0xff] }
  0x5b   : > { %1873 = vmatpush.bf16.msrb.mxu3 %v3187_v54  ;;  %v3183_v54 = vld [vmem:[#allocation5 + $0x1c8] sm:$0xff] }
  0x5c   : > { %1727 = vmatpush.bf16.msrb.mxu0 %v3162_v5  ;;  %v3158_v5 = vld [vmem:[#allocation5 + $0x100] sm:$0xff]  ;;  %v3039_v45 = vld [vmem:[%s3587_s17 + $0x44] sm:$0xf0]  ;;  %v2285_v47 = vld [vmem:[%s3587_s17 + $0x48] sm:$0xf0] }
  0x5d   : > { %1776 = vmatpush.bf16.msrb.mxu1 %v3170_v7  ;;  %v3166_v7 = vld [vmem:[#allocation5 + $0x140] sm:$0xff] }
  0x5e   : > { %1825 = vmatpush.bf16.msrb.mxu2 %v3178_v4  ;;  %v3174_v4 = vld [vmem:[#allocation5 + $0x180] sm:$0xff] }
  0x5f   : > { %1541 = vmatmul.bf16.gmra.mxu0 %v2308_v0  ;;  %1874 = vmatpush.bf16.msrb.mxu3 %v3186_v6  ;;  %v2500_v0 = vor.u32 %v3096_v57, %v2499_v56  ;;  %v3182_v6 = vld [vmem:[#allocation5 + $0x1c0] sm:$0xff]  ;;  %v3195_v56 = vld [vmem:[#allocation5 + $0x228] sm:$0xff] }
  0x60   : > { %1590 = vmatmul.bf16.gmra.mxu1 %v2312_v1  ;;  %1728 = vmatpush.bf16.msrb.mxu0 %v3161_v21  ;;  %v2504_v1 = vor.u32 %v3090_v58, %v2501_v59  ;;  %v3197_v21 = vld [vmem:[#allocation5 + $0x238] sm:$0xff]  ;;  %v3219_v57 = vld [vmem:[#allocation5 + $0x2e8] sm:$0xff] }
  0x61   : > { %1639 = vmatmul.bf16.gmra.mxu2 %v2316_v2  ;;  %1777 = vmatpush.bf16.msrb.mxu1 %v3169_v23  ;;  %v2508_v2 = vor.u32 %v3097_v61, %v2507_v60  ;;  %v3205_v23 = vld [vmem:[#allocation5 + $0x278] sm:$0xff] }
  0x62   : > { %1688 = vmatmul.bf16.gmra.mxu3 %v2320_v3  ;;  %1826 = vmatpush.bf16.msrb.mxu2 %v3177_v20  ;;  %v2512_v3 = vor.u32 %v3091_v62, %v2509_v63  ;;  %v3213_v20 = vld [vmem:[#allocation5 + $0x2b8] sm:$0xff] }
  0x63   : > { %1875 = vmatpush.bf16.msrb.mxu3 %v3185_v22  ;;  %v3221_v22 = vld [vmem:[#allocation5 + $0x2f8] sm:$0xff] }
  0x64   : > { %1729 = vmatpush.bf16.msrb.mxu0 %v3160_v37  ;;  %v3196_v37 = vld [vmem:[#allocation5 + $0x230] sm:$0xff] }
  0x65   : > { %1778 = vmatpush.bf16.msrb.mxu1 %v3168_v39  ;;  %v3204_v39 = vld [vmem:[#allocation5 + $0x270] sm:$0xff] }
  0x66   : > { %1827 = vmatpush.bf16.msrb.mxu2 %v3176_v36  ;;  %v3212_v36 = vld [vmem:[#allocation5 + $0x2b0] sm:$0xff] }
  0x67   : > { %1876 = vmatpush.bf16.msrb.mxu3 %v3184_v38  ;;  %v3220_v38 = vld [vmem:[#allocation5 + $0x2f0] sm:$0xff] }
  0x68   : > { %1730 = vmatpush.bf16.msrb.mxu0 %v3159_v53  ;;  %v2288_v53 = vor.u32 %v3033_v46, %v2285_v47 }
  0x69   : > { %1779 = vmatpush.bf16.msrb.mxu1 %v3167_v55  ;;  %v3211_v55 = vld [vmem:[#allocation5 + $0x2a8] sm:$0xff] }
  0x6a   : > { %1828 = vmatpush.bf16.msrb.mxu2 %v3175_v52  ;;  %v2284_v52 = vor.u32 %v3039_v45, %v2283_v44 }
  0x6b   : > { %1877 = vmatpush.bf16.msrb.mxu3 %v3183_v54 }
  0x6c   : > { %1731 = vmatpush.bf16.msrb.mxu0 %v3158_v5  ;;  %v2325_v5 = vld [vmem:[%s3587_s17 + $0xa0] sm:$0xf0] }
  0x6d   : > { %1780 = vmatpush.bf16.msrb.mxu1 %v3166_v7  ;;  %v3051_v7 = vld [vmem:[%s3587_s17 + $0xa4] sm:$0xf0] }
  0x6e   : > { %1829 = vmatpush.bf16.msrb.mxu2 %v3174_v4  ;;  %v3044_v4 = vld [vmem:[%s3587_s17 + $0x74] sm:$0xf] }
  0x6f   : > { %1546 = vmatmul.bf16.gmra.mxu0 %v2356_v16  ;;  %1878 = vmatpush.bf16.msrb.mxu3 %v3182_v6  ;;  %v2548_v16 = vor.u32 %v3108_v9, %v2547_v8  ;;  %v2331_v6 = vld [vmem:[%s3587_s17 + $0x78] sm:$0xf]  ;;  %v3045_v8 = vld [vmem:[%s3587_s17 + $0x7c] sm:$0xf]  ;;  %v2333_v9 = vld [vmem:[%s3587_s17 + $0xa8] sm:$0xf0] }
  0x70   : > { %1595 = vmatmul.bf16.gmra.mxu1 %v2360_v17  ;;  %v2552_v17 = vor.u32 %v3102_v10, %v2549_v11  ;;  %1920 = vmatpush.bf16.msra.mxu0 %v3197_v21  ;;  %v3210_v21 = vld [vmem:[#allocation5 + $0x2a0] sm:$0xff] }
  0x71   : > { %1644 = vmatmul.bf16.gmra.mxu2 %v2364_v18  ;;  %v2556_v18 = vor.u32 %v3109_v13, %v2555_v12  ;;  %1969 = vmatpush.bf16.msra.mxu1 %v3205_v23  ;;  %v2328_v13 = vor.u32 %v3044_v4, %v2325_v5  ;;  %v3218_v23 = vld [vmem:[#allocation5 + $0x2e0] sm:$0xff]  ;;  %v3075_v4 = vld [vmem:[%s3587_s17 + $0x164] sm:$0xf0]  ;;  %v3069_v5 = vld [vmem:[%s3587_s17 + $0x13c] sm:$0xf] }
  0x72   : > { %1693 = vmatmul.bf16.gmra.mxu3 %v2368_v19  ;;  %v2560_v19 = vor.u32 %v3103_v14, %v2557_v15  ;;  %2018 = vmatpush.bf16.msra.mxu2 %v3213_v20 }
  0x73   : > { %2067 = vmatpush.bf16.msra.mxu3 %v3221_v22  ;;  %v3194_v22 = vld [vmem:[#allocation5 + $0x220] sm:$0xff] }
  0x74   : > { %1921 = vmatpush.bf16.msra.mxu0 %v3196_v37  ;;  %v3063_v37 = vld [vmem:[%s3587_s17 + $0x104] sm:$0xf0] }
  0x75   : > { %1970 = vmatpush.bf16.msra.mxu1 %v3204_v39  ;;  %v2381_v39 = vld [vmem:[%s3587_s17 + $0x108] sm:$0xf0] }
  0x76   : > { %2019 = vmatpush.bf16.msra.mxu2 %v3212_v36  ;;  %v2379_v36 = vld [vmem:[%s3587_s17 + $0xd8] sm:$0xf] }
  0x77   : > { %2068 = vmatpush.bf16.msra.mxu3 %v3220_v38  ;;  %v3057_v38 = vld [vmem:[%s3587_s17 + $0xdc] sm:$0xf]  ;;  %v2380_v47 = vor.u32 %v3063_v37, %v2379_v36  ;;  %v3087_v36 = vld [vmem:[%s3587_s17 + $0x1c4] sm:$0xf0] }
  0x78   : > { %1922 = vmatpush.bf16.msra.mxu0 %v3195_v56  ;;  %v3081_v37 = vld [vmem:[%s3587_s17 + $0x19c] sm:$0xf] }
  0x7a   : > { %2020 = vmatpush.bf16.msra.mxu2 %v3211_v55 }
  0x7b   : > { %2069 = vmatpush.bf16.msra.mxu3 %v3219_v57 }
  0x7c   : > { %1923 = vmatpush.bf16.msra.mxu0 %v3194_v22 }
  0x7e   : > { %2021 = vmatpush.bf16.msra.mxu2 %v3210_v21  ;;  %v3216_v21 = vld [vmem:[#allocation5 + $0x2d0] sm:$0xff] }
  0x7f   : > { %1551 = vmatmul.bf16.gmra.mxu0 %v2404_v32  ;;  %v2596_v32 = vor.u32 %v3120_v25, %v2595_v24  ;;  %2070 = vmatpush.bf16.msra.mxu3 %v3218_v23 }
  0x80   : > { %1600 = vmatmul.bf16.gmra.mxu1 %v2408_v33  ;;  %v2600_v33 = vor.u32 %v3114_v26, %v2597_v27 }
  0x81   : > { %1649 = vmatmul.bf16.gmra.mxu2 %v2412_v34  ;;  %v2604_v34 = vor.u32 %v3121_v29, %v2603_v28 }
  0x82   : > { %1698 = vmatmul.bf16.gmra.mxu3 %v2416_v35  ;;  %v2608_v35 = vor.u32 %v3115_v30, %v2605_v31  ;;  %v3202_v31 = vld [vmem:[#allocation5 + $0x260] sm:$0xff] }
  0x8f   : > { %1556 = vmatmul.bf16.gmra.mxu0 %v2452_v48  ;;  %v2276_v48 = vor.u32 %v3038_v41, %v2275_v40 }
  0x90   : > { %1605 = vmatmul.bf16.gmra.mxu1 %v2456_v49  ;;  %v2280_v49 = vor.u32 %v3032_v42, %v2277_v43 }
  0x91   : > { %1654 = vmatmul.bf16.gmra.mxu2 %v2460_v50 }
  0x92   : > { %1703 = vmatmul.bf16.gmra.mxu3 %v2464_v51 }
  0x9f   : > { %1561 = vmatmul.bf16.gmra.mxu0 %v2500_v0 }
  0xa0   : > { %1610 = vmatmul.bf16.gmra.mxu1 %v2504_v1  ;;  %v3203_v1 = vld [vmem:[#allocation5 + $0x268] sm:$0xff] }
  0xa1   : > { %1659 = vmatmul.bf16.gmra.mxu2 %v2508_v2  ;;  %v2323_v2 = vld [vmem:[%s3587_s17 + $0x70] sm:$0xf]  ;;  %1971 = vmatpush.bf16.msra.mxu1 %v3203_v1  ;;  %v3068_v1 = vld [vmem:[%s3587_s17 + $0x134] sm:$0xf] }
  0xa2   : > { %1708 = vmatmul.bf16.gmra.mxu3 %v2512_v3  ;;  %v3050_v3 = vld [vmem:[%s3587_s17 + $0x9c] sm:$0xf0] }
  0xa3   : > { %v2324_v12 = vor.u32 %v3050_v3, %v2323_v2  ;;  %v2421_v2 = vld [vmem:[%s3587_s17 + $0x160] sm:$0xf0]  ;;  %v2427_v3 = vld [vmem:[%s3587_s17 + $0x138] sm:$0xf] }
  0xa5   : > { %1972 = vmatpush.bf16.msra.mxu1 %v3202_v31  ;;  %v2467_v31 = vld [vmem:[%s3587_s17 + $0x190] sm:$0xf] }
  0xaf   : > { %1566 = vmatmul.bf16.gmra.mxu0 %v2548_v16 }
  0xb0   : > { %1615 = vmatmul.bf16.gmra.mxu1 %v2552_v17  ;;  %v2332_v17 = vor.u32 %v3051_v7, %v2331_v6  ;;  %v2429_v6 = vld [vmem:[%s3587_s17 + $0x168] sm:$0xf0] }
  0xb1   : > { %1664 = vmatmul.bf16.gmra.mxu2 %v2556_v18  ;;  %v2336_v18 = vor.u32 %v3045_v8, %v2333_v9 }
  0xb2   : > { %1713 = vmatmul.bf16.gmra.mxu3 %v2560_v19 }
  0xbf   : > { %1571 = vmatmul.bf16.gmra.mxu0 %v2596_v32  ;;  %v2371_v32 = vld [vmem:[%s3587_s17 + $0xd0] sm:$0xf] }
  0xc0   : > { %1620 = vmatmul.bf16.gmra.mxu1 %v2600_v33  ;;  %v3062_v33 = vld [vmem:[%s3587_s17 + $0xfc] sm:$0xf0] }
  0xc1   : > { %1669 = vmatmul.bf16.gmra.mxu2 %v2604_v34  ;;  %v3056_v34 = vld [vmem:[%s3587_s17 + $0xd4] sm:$0xf]  ;;  %v2372_v42 = vor.u32 %v3062_v33, %v2371_v32  ;;  %v3086_v32 = vld [vmem:[%s3587_s17 + $0x1bc] sm:$0xf0] }
  0xc2   : > { %1718 = vmatmul.bf16.gmra.mxu3 %v2608_v35  ;;  %v2373_v35 = vld [vmem:[%s3587_s17 + $0x100] sm:$0xf0]  ;;  %v3080_v33 = vld [vmem:[%s3587_s17 + $0x194] sm:$0xf] }
  0xc3   : > { %v2376_v43 = vor.u32 %v3056_v34, %v2373_v35  ;;  %v2469_v34 = vld [vmem:[%s3587_s17 + $0x1c0] sm:$0xf0]  ;;  %v2475_v35 = vld [vmem:[%s3587_s17 + $0x198] sm:$0xf] }
  0xcc   : > { %v1537_v50 = vpop.f32.mrf.mxu0 }
  0xcd   : > { %v1586_v51 = vpop.f32.mrf.mxu1 }
  0xce   : > { %v1587_v54 = vadd.f32 %v1586_v51, %v1537_v50  ;;  %v3209_v51 = vld [vmem:[#allocation5 + $0x298] sm:$0xff] }
  0xcf   : > { %1732 = vmatmul.bf16.vlgmr.msrb.gmra.mxu0 %v2276_v48  ;;  %v2384_v48 = vor.u32 %v3057_v38, %v2381_v39  ;;  %2022 = vmatpush.bf16.msra.mxu2 %v3209_v51  ;;  %v2477_v38 = vld [vmem:[%s3587_s17 + $0x1c8] sm:$0xf0] }
  0xd0   : > { %1781 = vmatmul.bf16.vlgmr.msrb.gmra.mxu1 %v2280_v49  ;;  %v3207_v51 = vld [vmem:[#allocation5 + $0x288] sm:$0xff] }
  0xd1   : > { %1830 = vmatmul.bf16.vlgmr.msrb.gmra.mxu2 %v2284_v52  ;;  %v3193_v52 = vld [vmem:[#allocation5 + $0x218] sm:$0xff] }
  0xd2   : > { %1879 = vmatmul.bf16.vlgmr.msrb.gmra.mxu3 %v2288_v53  ;;  %v3217_v53 = vld [vmem:[#allocation5 + $0x2d8] sm:$0xff]  ;;  %1924 = vmatpush.bf16.msra.mxu0 %v3193_v52  ;;  %v3191_v52 = vld [vmem:[#allocation5 + $0x208] sm:$0xff] }
  0xd3   : > { %2071 = vmatpush.bf16.msra.mxu3 %v3217_v53  ;;  %v3215_v53 = vld [vmem:[#allocation5 + $0x2c8] sm:$0xff] }
  0xd4   : > { %v1635_v58 = vpop.f32.mrf.mxu2  ;;  %v1539_v61 = vpop.f32.mrf.mxu0 }
  0xd5   : > { %v1684_v59 = vpop.f32.mrf.mxu3  ;;  %v1636_v60 = vadd.f32 %v1635_v58, %v1587_v54  ;;  %v1588_v62 = vpop.f32.mrf.mxu1 }
  0xd6   : > { %v1589_v63 = vadd.f32 %v1588_v62, %v1539_v61  ;;  %v3201_v61 = vld [vmem:[#allocation5 + $0x258] sm:$0xff]  ;;  %v2419_v62 = vld [vmem:[%s3587_s17 + $0x130] sm:$0xf] }
  0xd7   : > { %v3669_v0 = vadd.f32 %v1684_v59, %v1636_v60  ;;  %1973 = vmatpush.bf16.msra.mxu1 %v3201_v61  ;;  %2072 = vmatpush.bf16.msra.mxu3 %v3216_v21  ;;  %v3206_v21 = vld [vmem:[#allocation5 + $0x280] sm:$0xff] }
  0xdb   : > { %2073 = vmatpush.bf16.msra.mxu3 %v3215_v53 }
  0xdc   : > { %v1637_v10 = vpop.f32.mrf.mxu2  ;;  %v1542_v15 = vpop.f32.mrf.mxu0 }
  0xdd   : > { %v1686_v11 = vpop.f32.mrf.mxu3  ;;  %v1638_v14 = vadd.f32 %v1637_v10, %v1589_v63  ;;  %v1591_v16 = vpop.f32.mrf.mxu1  ;;  %v3074_v63 = vld [vmem:[%s3587_s17 + $0x15c] sm:$0xf0]  ;;  %v2424_v10 = vor.u32 %v3068_v1, %v2421_v2  ;;  %v3092_v2 = vld [vmem:[%s3587_s17 + $0x1f4] sm:$0xf] }
  0xde   : > { %v1592_v19 = vadd.f32 %v1591_v16, %v1542_v15  ;;  %v2420_v9 = vor.u32 %v3074_v63, %v2419_v62  ;;  %v2432_v15 = vor.u32 %v3069_v5, %v2429_v6  ;;  %v3199_v62 = vld [vmem:[#allocation5 + $0x248] sm:$0xff]  ;;  %v2515_v63 = vld [vmem:[%s3587_s17 + $0x1f0] sm:$0xf]  ;;  %v3098_v1 = vld [vmem:[%s3587_s17 + $0x21c] sm:$0xf0] }
  0xdf   : > { %v3679_v20 = vadd.f32 %v1686_v11, %v1638_v14  ;;  %1737 = vmatmul.bf16.gmra.mxu0 %v2324_v12  ;;  %v2428_v14 = vor.u32 %v3075_v4, %v2427_v3  ;;  %v2517_v3 = vld [vmem:[%s3587_s17 + $0x220] sm:$0xf0]  ;;  %v2523_v4 = vld [vmem:[%s3587_s17 + $0x1f8] sm:$0xf]  ;;  %v3099_v5 = vld [vmem:[%s3587_s17 + $0x224] sm:$0xf0] }
  0xe0   : > { %1786 = vmatmul.bf16.gmra.mxu1 %v2328_v13  ;;  %v3093_v6 = vld [vmem:[%s3587_s17 + $0x1fc] sm:$0xf] }
  0xe1   : > { %1835 = vmatmul.bf16.gmra.mxu2 %v2332_v17 }
  0xe2   : > { %1884 = vmatmul.bf16.gmra.mxu3 %v2336_v18  ;;  %v3208_v18 = vld [vmem:[#allocation5 + $0x290] sm:$0xff] }
  0xe3   : > { %2023 = vmatpush.bf16.msra.mxu2 %v3208_v18 }
  0xe4   : > { %v1640_v24 = vpop.f32.mrf.mxu2  ;;  %v1544_v27 = vpop.f32.mrf.mxu0 }
  0xe5   : > { %v1689_v25 = vpop.f32.mrf.mxu3  ;;  %v1641_v26 = vadd.f32 %v1640_v24, %v1592_v19  ;;  %v1593_v28 = vpop.f32.mrf.mxu1  ;;  %v3192_v19 = vld [vmem:[#allocation5 + $0x210] sm:$0xff] }
  0xe6   : > { %v1594_v29 = vadd.f32 %v1593_v28, %v1544_v27  ;;  %1925 = vmatpush.bf16.msra.mxu0 %v3192_v19 }
  0xe7   : > { %v3681_v30 = vadd.f32 %v1689_v25, %v1641_v26  ;;  %2024 = vmatpush.bf16.msra.mxu2 %v3207_v51 }
  0xea   : > { %1926 = vmatpush.bf16.msra.mxu0 %v3191_v52 }
  0xeb   : > { %2025 = vmatpush.bf16.msra.mxu2 %v3206_v21 }
  0xec   : > { %v1642_v40 = vpop.f32.mrf.mxu2  ;;  %v1547_v45 = vpop.f32.mrf.mxu0 }
  0xed   : > { %v1691_v41 = vpop.f32.mrf.mxu3  ;;  %v1643_v44 = vadd.f32 %v1642_v40, %v1594_v29  ;;  %v1596_v46 = vpop.f32.mrf.mxu1  ;;  %v3200_v29 = vld [vmem:[#allocation5 + $0x250] sm:$0xff] }
  0xee   : > { %v1597_v49 = vadd.f32 %v1596_v46, %v1547_v45  ;;  %1974 = vmatpush.bf16.msra.mxu1 %v3200_v29  ;;  %v2476_v46 = vor.u32 %v3087_v36, %v2475_v35  ;;  %v3110_v35 = vld [vmem:[%s3587_s17 + $0x27c] sm:$0xf0]  ;;  %v3104_v36 = vld [vmem:[%s3587_s17 + $0x254] sm:$0xf] }
  0xef   : > { %v3691_v50 = vadd.f32 %v1691_v41, %v1643_v44  ;;  %1742 = vmatmul.bf16.gmra.mxu0 %v2372_v42  ;;  %v2468_v41 = vor.u32 %v3086_v32, %v2467_v31  ;;  %v2472_v42 = vor.u32 %v3080_v33, %v2469_v34  ;;  %v3198_v33 = vld [vmem:[#allocation5 + $0x240] sm:$0xff]  ;;  %v2563_v34 = vld [vmem:[%s3587_s17 + $0x250] sm:$0xf] }
  0xf0   : > { %1791 = vmatmul.bf16.gmra.mxu1 %v2376_v43 }
  0xf1   : > { %1840 = vmatmul.bf16.gmra.mxu2 %v2380_v47  ;;  %v2480_v47 = vor.u32 %v3081_v37, %v2477_v38  ;;  %v2565_v37 = vld [vmem:[%s3587_s17 + $0x280] sm:$0xf0]  ;;  %v2571_v38 = vld [vmem:[%s3587_s17 + $0x258] sm:$0xf] }
  0xf2   : > { %1889 = vmatmul.bf16.gmra.mxu3 %v2384_v48  ;;  %1975 = vmatpush.bf16.msra.mxu1 %v3199_v62 }
  0xf4   : > { %v1645_v54 = vpop.f32.mrf.mxu2  ;;  %v1549_v57 = vpop.f32.mrf.mxu0 }
  0xf5   : > { %v1694_v55 = vpop.f32.mrf.mxu3  ;;  %v1646_v56 = vadd.f32 %v1645_v54, %v1597_v49  ;;  %v1598_v58 = vpop.f32.mrf.mxu1 }
  0xf6   : > { %v1599_v59 = vadd.f32 %v1598_v58, %v1549_v57  ;;  %1976 = vmatpush.bf16.msra.mxu1 %v3198_v33  ;;  %v2291_v33 = vld [vmem:[%s3587_s17 + $0x20] sm:$0xf] }
  0xf7   : > { %v3693_v60 = vadd.f32 %v1694_v55, %v1646_v56 }
  0xfc   : > { %v1647_v7 = vpop.f32.mrf.mxu2  ;;  %v1552_v12 = vpop.f32.mrf.mxu0 }
  0xfd   : > { %v1696_v8 = vpop.f32.mrf.mxu3  ;;  %v1648_v11 = vadd.f32 %v1647_v7, %v1599_v59  ;;  %v1601_v13 = vpop.f32.mrf.mxu1  ;;  %v2525_v7 = vld [vmem:[%s3587_s17 + $0x228] sm:$0xf0] }
  0xfe   : > { %v1602_v16 = vadd.f32 %v1601_v13, %v1552_v12 }
  0xff   : > { %v3703_v17 = vadd.f32 %v1696_v8, %v1648_v11  ;;  %1747 = vmatmul.bf16.gmra.mxu0 %v2420_v9  ;;  %v2520_v11 = vor.u32 %v3092_v2, %v2517_v3  ;;  %v3122_v2 = vld [vmem:[%s3587_s17 + $0x2dc] sm:$0xf0]  ;;  %v3116_v3 = vld [vmem:[%s3587_s17 + $0x2b4] sm:$0xf] }
 0x100   : > { %1796 = vmatmul.bf16.gmra.mxu1 %v2424_v10  ;;  %v2516_v10 = vor.u32 %v3098_v1, %v2515_v63  ;;  %v2611_v1 = vld [vmem:[%s3587_s17 + $0x2b0] sm:$0xf] }
 0x101   : > { %1845 = vmatmul.bf16.gmra.mxu2 %v2428_v14 }
 0x102   : > { %1894 = vmatmul.bf16.gmra.mxu3 %v2432_v15  ;;  %v2524_v15 = vor.u32 %v3099_v5, %v2523_v4  ;;  %v2613_v4 = vld [vmem:[%s3587_s17 + $0x2e0] sm:$0xf0]  ;;  %v2619_v5 = vld [vmem:[%s3587_s17 + $0x2b8] sm:$0xf] }
 0x104   : > { %v1650_v22 = vpop.f32.mrf.mxu2  ;;  %v1554_v25 = vpop.f32.mrf.mxu0 }
 0x105   : > { %v1699_v23 = vpop.f32.mrf.mxu3  ;;  %v1651_v24 = vadd.f32 %v1650_v22, %v1602_v16  ;;  %v1603_v26 = vpop.f32.mrf.mxu1  ;;  %v2528_v16 = vor.u32 %v3093_v6, %v2525_v7  ;;  %v3190_v22 = vld [vmem:[#allocation5 + $0x200] sm:$0xff]  ;;  %v3123_v6 = vld [vmem:[%s3587_s17 + $0x2e4] sm:$0xf0]  ;;  %v3117_v7 = vld [vmem:[%s3587_s17 + $0x2bc] sm:$0xf] }
 0x106   : > { %v1604_v27 = vadd.f32 %v1603_v26, %v1554_v25  ;;  %1927 = vmatpush.bf16.msra.mxu0 %v3190_v22 }
 0x107   : > { %v3705_v28 = vadd.f32 %v1699_v23, %v1651_v24  ;;  %v3214_v23 = vld [vmem:[#allocation5 + $0x2c0] sm:$0xff] }
 0x108   : > { %2074 = vmatpush.bf16.msra.mxu3 %v3214_v23 }
 0x10c   : > { %v1652_v39 = vpop.f32.mrf.mxu2  ;;  %v1557_v44 = vpop.f32.mrf.mxu0 }
 0x10d   : > { %v1701_v40 = vpop.f32.mrf.mxu3  ;;  %v1653_v43 = vadd.f32 %v1652_v39, %v1604_v27  ;;  %v1606_v45 = vpop.f32.mrf.mxu1  ;;  %v3111_v39 = vld [vmem:[%s3587_s17 + $0x284] sm:$0xf0] }
 0x10e   : > { %v1607_v48 = vadd.f32 %v1606_v45, %v1557_v44  ;;  %v2564_v44 = vor.u32 %v3110_v35, %v2563_v34  ;;  %v2568_v45 = vor.u32 %v3104_v36, %v2565_v37  ;;  %v2572_v51 = vor.u32 %v3111_v39, %v2571_v38  ;;  %v3040_v34 = vld [vmem:[%s3587_s17 + $0x4c] sm:$0xf0]  ;;  %v3034_v35 = vld [vmem:[%s3587_s17 + $0x24] sm:$0xf]  ;;  %v2293_v36 = vld [vmem:[%s3587_s17 + $0x50] sm:$0xf0] }
 0x10f   : > { %v3715_v49 = vadd.f32 %v1701_v40, %v1653_v43  ;;  %1752 = vmatmul.bf16.gmra.mxu0 %v2468_v41  ;;  %v3105_v40 = vld [vmem:[%s3587_s17 + $0x25c] sm:$0xf]  ;;  %v2573_v41 = vld [vmem:[%s3587_s17 + $0x288] sm:$0xf0]  ;;  %v2299_v37 = vld [vmem:[%s3587_s17 + $0x28] sm:$0xf] }
 0x110   : > { %1801 = vmatmul.bf16.gmra.mxu1 %v2472_v42  ;;  %v2576_v52 = vor.u32 %v3105_v40, %v2573_v41  ;;  %v3041_v38 = vld [vmem:[%s3587_s17 + $0x54] sm:$0xf0]  ;;  %v3035_v39 = vld [vmem:[%s3587_s17 + $0x2c] sm:$0xf]  ;;  %v2301_v40 = vld [vmem:[%s3587_s17 + $0x58] sm:$0xf0] }
 0x111   : > { %1850 = vmatmul.bf16.gmra.mxu2 %v2476_v46 }
 0x112   : > { %1899 = vmatmul.bf16.gmra.mxu3 %v2480_v47 }
 0x114   : > { %v1655_v54 = vpop.f32.mrf.mxu2  ;;  %v1559_v57 = vpop.f32.mrf.mxu0 }
 0x115   : > { %v1704_v55 = vpop.f32.mrf.mxu3  ;;  %v1656_v56 = vadd.f32 %v1655_v54, %v1607_v48  ;;  %v1608_v58 = vpop.f32.mrf.mxu1 }
 0x116   : > { %v1609_v59 = vadd.f32 %v1608_v58, %v1559_v57 }
 0x117   : > { %v3717_v61 = vadd.f32 %v1704_v55, %v1656_v56 }
 0x11c   : > { %v1657_v8 = vpop.f32.mrf.mxu2  ;;  %v1562_v13 = vpop.f32.mrf.mxu0 }
 0x11d   : > { %v1706_v9 = vpop.f32.mrf.mxu3  ;;  %v1658_v12 = vadd.f32 %v1657_v8, %v1609_v59  ;;  %v1611_v14 = vpop.f32.mrf.mxu1  ;;  %v2621_v8 = vld [vmem:[%s3587_s17 + $0x2e8] sm:$0xf0] }
 0x11e   : > { %v1612_v18 = vadd.f32 %v1611_v14, %v1562_v13 }
 0x11f   : > { %v3727_v19 = vadd.f32 %v1706_v9, %v1658_v12  ;;  %1757 = vmatmul.bf16.gmra.mxu0 %v2516_v10  ;;  %v2616_v12 = vor.u32 %v3116_v3, %v2613_v4  ;;  %v2339_v3 = vld [vmem:[%s3587_s17 + $0x80] sm:$0xf]  ;;  %v3052_v4 = vld [vmem:[%s3587_s17 + $0xac] sm:$0xf0] }
 0x120   : > { %1806 = vmatmul.bf16.gmra.mxu1 %v2520_v11  ;;  %v2612_v11 = vor.u32 %v3122_v2, %v2611_v1 }
 0x121   : > { %1855 = vmatmul.bf16.gmra.mxu2 %v2524_v15 }
 0x122   : > { %1904 = vmatmul.bf16.gmra.mxu3 %v2528_v16  ;;  %v2620_v16 = vor.u32 %v3123_v6, %v2619_v5  ;;  %v3046_v5 = vld [vmem:[%s3587_s17 + $0x84] sm:$0xf]  ;;  %v2341_v6 = vld [vmem:[%s3587_s17 + $0xb0] sm:$0xf0] }
 0x124   : > { %v1660_v24 = vpop.f32.mrf.mxu2  ;;  %v1564_v27 = vpop.f32.mrf.mxu0 }
 0x125   : > { %v1709_v25 = vpop.f32.mrf.mxu3  ;;  %v1661_v26 = vadd.f32 %v1660_v24, %v1612_v18  ;;  %v1613_v29 = vpop.f32.mrf.mxu1  ;;  %v2624_v18 = vor.u32 %v3117_v7, %v2621_v8  ;;  %v2347_v7 = vld [vmem:[%s3587_s17 + $0x88] sm:$0xf]  ;;  %v3053_v8 = vld [vmem:[%s3587_s17 + $0xb4] sm:$0xf0] }
 0x126   : > { %v1614_v31 = vadd.f32 %v1613_v29, %v1564_v27 }
 0x127   : > { %v3729_v32 = vadd.f32 %v1709_v25, %v1661_v26 }
 0x12c   : > { %v1662_v42 = vpop.f32.mrf.mxu2  ;;  %v1567_v47 = vpop.f32.mrf.mxu0 }
 0x12d   : > { %v1711_v43 = vpop.f32.mrf.mxu3  ;;  %v1663_v46 = vadd.f32 %v1662_v42, %v1614_v31  ;;  %v1616_v48 = vpop.f32.mrf.mxu1 }
 0x12e   : > { %v1617_v53 = vadd.f32 %v1616_v48, %v1567_v47  ;;  %v2300_v48 = vor.u32 %v3041_v38, %v2299_v37  ;;  %v2387_v37 = vld [vmem:[%s3587_s17 + $0xe0] sm:$0xf]  ;;  %v3064_v38 = vld [vmem:[%s3587_s17 + $0x10c] sm:$0xf0] }
 0x12f   : > { %v3739_v54 = vadd.f32 %v1711_v43, %v1663_v46  ;;  %1762 = vmatmul.bf16.gmra.mxu0 %v2564_v44  ;;  %v2292_v43 = vor.u32 %v3040_v34, %v2291_v33  ;;  %v2296_v44 = vor.u32 %v3034_v35, %v2293_v36 }
 0x130   : > { %1811 = vmatmul.bf16.gmra.mxu1 %v2568_v45 }
 0x131   : > { %1860 = vmatmul.bf16.gmra.mxu2 %v2572_v51  ;;  %v2304_v51 = vor.u32 %v3035_v39, %v2301_v40  ;;  %v3058_v39 = vld [vmem:[%s3587_s17 + $0xe4] sm:$0xf]  ;;  %v2389_v40 = vld [vmem:[%s3587_s17 + $0x110] sm:$0xf0] }
 0x132   : > { %1909 = vmatmul.bf16.gmra.mxu3 %v2576_v52 }
 0x134   : > { %v1665_v55 = vpop.f32.mrf.mxu2  ;;  %v1569_v58 = vpop.f32.mrf.mxu0 }
 0x135   : > { %v1714_v56 = vpop.f32.mrf.mxu3  ;;  %v1666_v57 = vadd.f32 %v1665_v55, %v1617_v53  ;;  %v1618_v59 = vpop.f32.mrf.mxu1 }
 0x136   : > { %v1619_v62 = vadd.f32 %v1618_v59, %v1569_v58 }
 0x137   : > { %v3741_v63 = vadd.f32 %v1714_v56, %v1666_v57 }
 0x13c   : > { %v1667_v9 = vpop.f32.mrf.mxu2  ;;  %v1572_v14 = vpop.f32.mrf.mxu0 }
 0x13d   : > { %v1716_v10 = vpop.f32.mrf.mxu3  ;;  %v1668_v13 = vadd.f32 %v1667_v9, %v1619_v62  ;;  %v1621_v15 = vpop.f32.mrf.mxu1  ;;  %v3047_v9 = vld [vmem:[%s3587_s17 + $0x8c] sm:$0xf] }
 0x13e   : > { %v1622_v21 = vadd.f32 %v1621_v15, %v1572_v14  ;;  %v2344_v14 = vor.u32 %v3046_v5, %v2341_v6 }
 0x13f   : > { %v3751_v22 = vadd.f32 %v1716_v10, %v1668_v13  ;;  %1767 = vmatmul.bf16.gmra.mxu0 %v2612_v11  ;;  %v2349_v10 = vld [vmem:[%s3587_s17 + $0xb8] sm:$0xf0]  ;;  %v2340_v13 = vor.u32 %v3052_v4, %v2339_v3 }
 0x140   : > { %1816 = vmatmul.bf16.gmra.mxu1 %v2616_v12 }
 0x141   : > { %1865 = vmatmul.bf16.gmra.mxu2 %v2620_v16 }
 0x142   : > { %1914 = vmatmul.bf16.gmra.mxu3 %v2624_v18 }
 0x144   : > { %v1670_v23 = vpop.f32.mrf.mxu2  ;;  %v1574_v26 = vpop.f32.mrf.mxu0 }
 0x145   : > { %v1719_v24 = vpop.f32.mrf.mxu3  ;;  %v1671_v25 = vadd.f32 %v1670_v23, %v1622_v21  ;;  %v1623_v27 = vpop.f32.mrf.mxu1  ;;  %v2348_v21 = vor.u32 %v3053_v8, %v2347_v7  ;;  %v2435_v7 = vld [vmem:[%s3587_s17 + $0x140] sm:$0xf]  ;;  %v3076_v8 = vld [vmem:[%s3587_s17 + $0x16c] sm:$0xf0] }
 0x146   : > { %v1624_v29 = vadd.f32 %v1623_v27, %v1574_v26 }
 0x147   : > { %v3753_v31 = vadd.f32 %v1719_v24, %v1671_v25 }
 0x14c   : > { %v1672_v41 = vpop.f32.mrf.mxu2  ;;  %v1733_v46 = vpop.f32.mrf.mxu0 }
 0x14d   : > { %v1721_v42 = vpop.f32.mrf.mxu3  ;;  %v1673_v45 = vadd.f32 %v1672_v41, %v1624_v29  ;;  %v1782_v47 = vpop.f32.mrf.mxu1  ;;  %v1734_v52 = vadd.f32 %v1733_v46, %v3669_v0  ;;  %v2395_v41 = vld [vmem:[%s3587_s17 + $0xe8] sm:$0xf] }
 0x14f   : > { %v3764_v53 = vadd.f32 %v1721_v42, %v1673_v45  ;;  %v1783_v55 = vadd.f32 %v1782_v47, %v1734_v52  ;;  %1928 = vmatmul.bf16.vlgmr.msra.gmra.mxu0 %v2292_v43  ;;  %v3065_v42 = vld [vmem:[%s3587_s17 + $0x114] sm:$0xf0]  ;;  %v3059_v43 = vld [vmem:[%s3587_s17 + $0xec] sm:$0xf]  ;;  %v2388_v47 = vor.u32 %v3064_v38, %v2387_v37 }
 0x150   : > { %1977 = vmatmul.bf16.vlgmr.msra.gmra.mxu1 %v2296_v44  ;;  %v2397_v44 = vld [vmem:[%s3587_s17 + $0x118] sm:$0xf0] }
 0x151   : > { %2026 = vmatmul.bf16.vlgmr.msra.gmra.mxu2 %v2300_v48  ;;  %v2392_v48 = vor.u32 %v3058_v39, %v2389_v40 }
 0x152   : > { %2075 = vmatmul.bf16.vlgmr.msra.gmra.mxu3 %v2304_v51 }
 0x154   : > { %v1831_v56 = vpop.f32.mrf.mxu2  ;;  %v1735_v59 = vpop.f32.mrf.mxu0 }
 0x155   : > { %v1880_v57 = vpop.f32.mrf.mxu3  ;;  %v1832_v58 = vadd.f32 %v1831_v56, %v1783_v55  ;;  %v1784_v62 = vpop.f32.mrf.mxu1  ;;  %v1736_v0 = vadd.f32 %v1735_v59, %v3679_v20  ;;  %v2352_v20 = vor.u32 %v3047_v9, %v2349_v10  ;;  %v2396_v56 = vor.u32 %v3065_v42, %v2395_v41  ;;  %v3070_v9 = vld [vmem:[%s3587_s17 + $0x144] sm:$0xf]  ;;  %v2437_v10 = vld [vmem:[%s3587_s17 + $0x170] sm:$0xf0]  ;;  %v2483_v41 = vld [vmem:[%s3587_s17 + $0x1a0] sm:$0xf] }
 0x156   : > { %v3088_v42 = vld [vmem:[%s3587_s17 + $0x1cc] sm:$0xf0] }
 0x157   : > { %v3767_v1 = vadd.f32 %v1880_v57, %v1832_v58  ;;  %v1785_v2 = vadd.f32 %v1784_v62, %v1736_v0 }
 0x15c   : > { %v1833_v11 = vpop.f32.mrf.mxu2  ;;  %v1738_v16 = vpop.f32.mrf.mxu0 }
 0x15d   : > { %v1882_v12 = vpop.f32.mrf.mxu3  ;;  %v1834_v15 = vadd.f32 %v1833_v11, %v1785_v2  ;;  %v1787_v18 = vpop.f32.mrf.mxu1  ;;  %v1739_v23 = vadd.f32 %v1738_v16, %v3681_v30  ;;  %v2443_v11 = vld [vmem:[%s3587_s17 + $0x148] sm:$0xf] }
 0x15f   : > { %v3778_v24 = vadd.f32 %v1882_v12, %v1834_v15  ;;  %v1788_v25 = vadd.f32 %v1787_v18, %v1739_v23  ;;  %1933 = vmatmul.bf16.gmra.mxu0 %v2340_v13  ;;  %v3077_v12 = vld [vmem:[%s3587_s17 + $0x174] sm:$0xf0]  ;;  %v3071_v13 = vld [vmem:[%s3587_s17 + $0x14c] sm:$0xf]  ;;  %v2436_v18 = vor.u32 %v3076_v8, %v2435_v7 }
 0x160   : > { %1982 = vmatmul.bf16.gmra.mxu1 %v2344_v14  ;;  %v2445_v14 = vld [vmem:[%s3587_s17 + $0x178] sm:$0xf0] }
 0x161   : > { %2031 = vmatmul.bf16.gmra.mxu2 %v2348_v21  ;;  %v2440_v21 = vor.u32 %v3070_v9, %v2437_v10 }
 0x162   : > { %2080 = vmatmul.bf16.gmra.mxu3 %v2352_v20 }
 0x164   : > { %v1836_v26 = vpop.f32.mrf.mxu2  ;;  %v1740_v33 = vpop.f32.mrf.mxu0 }
 0x165   : > { %v1885_v27 = vpop.f32.mrf.mxu3  ;;  %v1837_v29 = vadd.f32 %v1836_v26, %v1788_v25  ;;  %v1789_v34 = vpop.f32.mrf.mxu1  ;;  %v1741_v30 = vadd.f32 %v1740_v33, %v3691_v50  ;;  %v2400_v50 = vor.u32 %v3059_v43, %v2397_v44  ;;  %v2444_v26 = vor.u32 %v3077_v12, %v2443_v11  ;;  %v3082_v43 = vld [vmem:[%s3587_s17 + $0x1a4] sm:$0xf]  ;;  %v2485_v44 = vld [vmem:[%s3587_s17 + $0x1d0] sm:$0xf0]  ;;  %v2531_v11 = vld [vmem:[%s3587_s17 + $0x200] sm:$0xf] }
 0x166   : > { %v3100_v12 = vld [vmem:[%s3587_s17 + $0x22c] sm:$0xf0] }
 0x167   : > { %v3781_v35 = vadd.f32 %v1885_v27, %v1837_v29  ;;  %v1790_v36 = vadd.f32 %v1789_v34, %v1741_v30 }
 0x16c   : > { %v1838_v45 = vpop.f32.mrf.mxu2  ;;  %v1743_v52 = vpop.f32.mrf.mxu0 }
 0x16d   : > { %v1887_v46 = vpop.f32.mrf.mxu3  ;;  %v1839_v51 = vadd.f32 %v1838_v45, %v1790_v36  ;;  %v1792_v55 = vpop.f32.mrf.mxu1  ;;  %v1744_v57 = vadd.f32 %v1743_v52, %v3693_v60  ;;  %v2491_v45 = vld [vmem:[%s3587_s17 + $0x1a8] sm:$0xf] }
 0x16f   : > { %v3792_v58 = vadd.f32 %v1887_v46, %v1839_v51  ;;  %v1793_v59 = vadd.f32 %v1792_v55, %v1744_v57  ;;  %1938 = vmatmul.bf16.gmra.mxu0 %v2388_v47  ;;  %v3089_v46 = vld [vmem:[%s3587_s17 + $0x1d4] sm:$0xf0]  ;;  %v3083_v47 = vld [vmem:[%s3587_s17 + $0x1ac] sm:$0xf]  ;;  %v2484_v55 = vor.u32 %v3088_v42, %v2483_v41 }
 0x170   : > { %1987 = vmatmul.bf16.gmra.mxu1 %v2392_v48  ;;  %v2493_v48 = vld [vmem:[%s3587_s17 + $0x1d8] sm:$0xf0] }
 0x171   : > { %2036 = vmatmul.bf16.gmra.mxu2 %v2396_v56  ;;  %v2488_v56 = vor.u32 %v3082_v43, %v2485_v44 }
 0x172   : > { %2085 = vmatmul.bf16.gmra.mxu3 %v2400_v50 }
 0x174   : > { %v1841_v62 = vpop.f32.mrf.mxu2  ;;  %v1745_v3 = vpop.f32.mrf.mxu0 }
 0x175   : > { %v1890_v0 = vpop.f32.mrf.mxu3  ;;  %v1842_v2 = vadd.f32 %v1841_v62, %v1793_v59  ;;  %v1794_v4 = vpop.f32.mrf.mxu1  ;;  %v1746_v60 = vadd.f32 %v1745_v3, %v3703_v17  ;;  %v2448_v17 = vor.u32 %v3071_v13, %v2445_v14  ;;  %v2492_v62 = vor.u32 %v3089_v46, %v2491_v45  ;;  %v3094_v13 = vld [vmem:[%s3587_s17 + $0x204] sm:$0xf]  ;;  %v2533_v14 = vld [vmem:[%s3587_s17 + $0x230] sm:$0xf0]  ;;  %v2579_v45 = vld [vmem:[%s3587_s17 + $0x260] sm:$0xf] }
 0x176   : > { %v3112_v46 = vld [vmem:[%s3587_s17 + $0x28c] sm:$0xf0] }
 0x177   : > { %v3795_v5 = vadd.f32 %v1890_v0, %v1842_v2  ;;  %v1795_v6 = vadd.f32 %v1794_v4, %v1746_v60 }
 0x17c   : > { %v1843_v15 = vpop.f32.mrf.mxu2  ;;  %v1748_v23 = vpop.f32.mrf.mxu0 }
 0x17d   : > { %v1892_v16 = vpop.f32.mrf.mxu3  ;;  %v1844_v20 = vadd.f32 %v1843_v15, %v1795_v6  ;;  %v1797_v25 = vpop.f32.mrf.mxu1  ;;  %v1749_v27 = vadd.f32 %v1748_v23, %v3705_v28  ;;  %v2539_v15 = vld [vmem:[%s3587_s17 + $0x208] sm:$0xf] }
 0x17f   : > { %v3806_v29 = vadd.f32 %v1892_v16, %v1844_v20  ;;  %v1798_v33 = vadd.f32 %v1797_v25, %v1749_v27  ;;  %1943 = vmatmul.bf16.gmra.mxu0 %v2436_v18  ;;  %v3101_v16 = vld [vmem:[%s3587_s17 + $0x234] sm:$0xf0]  ;;  %v3095_v18 = vld [vmem:[%s3587_s17 + $0x20c] sm:$0xf]  ;;  %v2532_v25 = vor.u32 %v3100_v12, %v2531_v11 }
 0x180   : > { %1992 = vmatmul.bf16.gmra.mxu1 %v2440_v21  ;;  %v2541_v21 = vld [vmem:[%s3587_s17 + $0x238] sm:$0xf0] }
 0x181   : > { %2041 = vmatmul.bf16.gmra.mxu2 %v2444_v26  ;;  %v2536_v26 = vor.u32 %v3094_v13, %v2533_v14 }
 0x182   : > { %2090 = vmatmul.bf16.gmra.mxu3 %v2448_v17 }
 0x184   : > { %v1846_v34 = vpop.f32.mrf.mxu2  ;;  %v1750_v37 = vpop.f32.mrf.mxu0 }
 0x185   : > { %v1895_v30 = vpop.f32.mrf.mxu3  ;;  %v1847_v36 = vadd.f32 %v1846_v34, %v1798_v33  ;;  %v1799_v38 = vpop.f32.mrf.mxu1  ;;  %v1751_v28 = vadd.f32 %v1750_v37, %v3715_v49  ;;  %v2496_v49 = vor.u32 %v3083_v47, %v2493_v48  ;;  %v2540_v34 = vor.u32 %v3101_v16, %v2539_v15  ;;  %v3106_v47 = vld [vmem:[%s3587_s17 + $0x264] sm:$0xf]  ;;  %v2581_v48 = vld [vmem:[%s3587_s17 + $0x290] sm:$0xf0]  ;;  %v2627_v15 = vld [vmem:[%s3587_s17 + $0x2c0] sm:$0xf] }
 0x186   : > { %v3124_v16 = vld [vmem:[%s3587_s17 + $0x2ec] sm:$0xf0] }
 0x187   : > { %v3809_v39 = vadd.f32 %v1895_v30, %v1847_v36  ;;  %v1800_v40 = vadd.f32 %v1799_v38, %v1751_v28 }
 0x18c   : > { %v1848_v51 = vpop.f32.mrf.mxu2  ;;  %v1753_v57 = vpop.f32.mrf.mxu0 }
 0x18d   : > { %v1897_v52 = vpop.f32.mrf.mxu3  ;;  %v1849_v50 = vadd.f32 %v1848_v51, %v1800_v40  ;;  %v1802_v59 = vpop.f32.mrf.mxu1  ;;  %v1754_v0 = vadd.f32 %v1753_v57, %v3717_v61  ;;  %v2587_v51 = vld [vmem:[%s3587_s17 + $0x268] sm:$0xf] }
 0x18f   : > { %v3820_v2 = vadd.f32 %v1897_v52, %v1849_v50  ;;  %v1803_v3 = vadd.f32 %v1802_v59, %v1754_v0  ;;  %1948 = vmatmul.bf16.gmra.mxu0 %v2484_v55  ;;  %v3113_v52 = vld [vmem:[%s3587_s17 + $0x294] sm:$0xf0]  ;;  %v3107_v55 = vld [vmem:[%s3587_s17 + $0x26c] sm:$0xf]  ;;  %v2580_v59 = vor.u32 %v3112_v46, %v2579_v45 }
 0x190   : > { %1997 = vmatmul.bf16.gmra.mxu1 %v2488_v56  ;;  %v2589_v56 = vld [vmem:[%s3587_s17 + $0x298] sm:$0xf0] }
 0x191   : > { %2046 = vmatmul.bf16.gmra.mxu2 %v2492_v62  ;;  %v2584_v62 = vor.u32 %v3106_v47, %v2581_v48 }
 0x192   : > { %2095 = vmatmul.bf16.gmra.mxu3 %v2496_v49 }
 0x194   : > { %v1851_v4 = vpop.f32.mrf.mxu2  ;;  %v1755_v7 = vpop.f32.mrf.mxu0 }
 0x195   : > { %v1900_v60 = vpop.f32.mrf.mxu3  ;;  %v1852_v6 = vadd.f32 %v1851_v4, %v1803_v3  ;;  %v1804_v8 = vpop.f32.mrf.mxu1  ;;  %v1756_v61 = vadd.f32 %v1755_v7, %v3727_v19  ;;  %v2544_v19 = vor.u32 %v3095_v18, %v2541_v21  ;;  %v2588_v4 = vor.u32 %v3113_v52, %v2587_v51  ;;  %v3118_v18 = vld [vmem:[%s3587_s17 + $0x2c4] sm:$0xf]  ;;  %v2629_v21 = vld [vmem:[%s3587_s17 + $0x2f0] sm:$0xf0] }
 0x197   : > { %v3823_v9 = vadd.f32 %v1900_v60, %v1852_v6  ;;  %v1805_v10 = vadd.f32 %v1804_v8, %v1756_v61 }
 0x19c   : > { %v1853_v20 = vpop.f32.mrf.mxu2  ;;  %v1758_v27 = vpop.f32.mrf.mxu0 }
 0x19d   : > { %v1902_v23 = vpop.f32.mrf.mxu3  ;;  %v1854_v17 = vadd.f32 %v1853_v20, %v1805_v10  ;;  %v1807_v33 = vpop.f32.mrf.mxu1  ;;  %v1759_v30 = vadd.f32 %v1758_v27, %v3729_v32  ;;  %v2635_v20 = vld [vmem:[%s3587_s17 + $0x2c8] sm:$0xf] }
 0x19f   : > { %v3834_v36 = vadd.f32 %v1902_v23, %v1854_v17  ;;  %v1808_v37 = vadd.f32 %v1807_v33, %v1759_v30  ;;  %1953 = vmatmul.bf16.gmra.mxu0 %v2532_v25  ;;  %v3125_v23 = vld [vmem:[%s3587_s17 + $0x2f4] sm:$0xf0]  ;;  %v3119_v25 = vld [vmem:[%s3587_s17 + $0x2cc] sm:$0xf]  ;;  %v2628_v33 = vor.u32 %v3124_v16, %v2627_v15 }
 0x1a0   : > { %2002 = vmatmul.bf16.gmra.mxu1 %v2536_v26  ;;  %v2637_v26 = vld [vmem:[%s3587_s17 + $0x2f8] sm:$0xf0] }
 0x1a1   : > { %2051 = vmatmul.bf16.gmra.mxu2 %v2540_v34  ;;  %v2632_v34 = vor.u32 %v3118_v18, %v2629_v21 }
 0x1a2   : > { %2100 = vmatmul.bf16.gmra.mxu3 %v2544_v19 }
 0x1a4   : > { %v1856_v38 = vpop.f32.mrf.mxu2  ;;  %v1760_v41 = vpop.f32.mrf.mxu0 }
 0x1a5   : > { %v1905_v28 = vpop.f32.mrf.mxu3  ;;  %v1857_v40 = vadd.f32 %v1856_v38, %v1808_v37  ;;  %v1809_v42 = vpop.f32.mrf.mxu1  ;;  %v1761_v32 = vadd.f32 %v1760_v41, %v3739_v54  ;;  %v2592_v54 = vor.u32 %v3107_v55, %v2589_v56  ;;  %v2636_v38 = vor.u32 %v3125_v23, %v2635_v20 }
 0x1a7   : > { %v3837_v43 = vadd.f32 %v1905_v28, %v1857_v40  ;;  %v1810_v44 = vadd.f32 %v1809_v42, %v1761_v32 }
 0x1ac   : > { %v1858_v50 = vpop.f32.mrf.mxu2  ;;  %v1763_v0 = vpop.f32.mrf.mxu0 }
 0x1ad   : > { %v1907_v57 = vpop.f32.mrf.mxu3  ;;  %v1859_v49 = vadd.f32 %v1858_v50, %v1810_v44  ;;  %v1812_v3 = vpop.f32.mrf.mxu1  ;;  %v1764_v60 = vadd.f32 %v1763_v0, %v3741_v63 }
 0x1af   : > { %v3848_v6 = vadd.f32 %v1907_v57, %v1859_v49  ;;  %v1813_v7 = vadd.f32 %v1812_v3, %v1764_v60  ;;  %1958 = vmatmul.bf16.gmra.mxu0 %v2580_v59 }
 0x1b0   : > { %2007 = vmatmul.bf16.gmra.mxu1 %v2584_v62 }
 0x1b1   : > { %2056 = vmatmul.bf16.gmra.mxu2 %v2588_v4 }
 0x1b2   : > { %2105 = vmatmul.bf16.gmra.mxu3 %v2592_v54 }
 0x1b4   : > { %v1861_v8 = vpop.f32.mrf.mxu2  ;;  %v1765_v11 = vpop.f32.mrf.mxu0 }
 0x1b5   : > { %v1910_v61 = vpop.f32.mrf.mxu3  ;;  %v1862_v10 = vadd.f32 %v1861_v8, %v1813_v7  ;;  %v1814_v12 = vpop.f32.mrf.mxu1  ;;  %v1766_v63 = vadd.f32 %v1765_v11, %v3751_v22  ;;  %v2640_v22 = vor.u32 %v3119_v25, %v2637_v26 }
 0x1b7   : > { %v3851_v13 = vadd.f32 %v1910_v61, %v1862_v10  ;;  %v1815_v14 = vadd.f32 %v1814_v12, %v1766_v63 }
 0x1bc   : > { %v1863_v17 = vpop.f32.mrf.mxu2  ;;  %v1768_v30 = vpop.f32.mrf.mxu0 }
 0x1bd   : > { %v1912_v27 = vpop.f32.mrf.mxu3  ;;  %v1864_v19 = vadd.f32 %v1863_v17, %v1815_v14  ;;  %v1817_v37 = vpop.f32.mrf.mxu1  ;;  %v1769_v28 = vadd.f32 %v1768_v30, %v3753_v31 }
 0x1bf   : > { %v3862_v40 = vadd.f32 %v1912_v27, %v1864_v19  ;;  %v1818_v41 = vadd.f32 %v1817_v37, %v1769_v28  ;;  %1963 = vmatmul.bf16.gmra.mxu0 %v2628_v33 }
 0x1c0   : > { %2012 = vmatmul.bf16.gmra.mxu1 %v2632_v34 }
 0x1c1   : > { %2061 = vmatmul.bf16.gmra.mxu2 %v2636_v38 }
 0x1c2   : > { %2110 = vmatmul.bf16.gmra.mxu3 %v2640_v22 }
 0x1c4   : > { %v1866_v42 = vpop.f32.mrf.mxu2  ;;  %v1770_v45 = vpop.f32.mrf.mxu0 }
 0x1c5   : > { %v1915_v32 = vpop.f32.mrf.mxu3  ;;  %v1867_v44 = vadd.f32 %v1866_v42, %v1818_v41  ;;  %v1819_v46 = vpop.f32.mrf.mxu1  ;;  %v1771_v47 = vadd.f32 %v1770_v45, %v3764_v53 }
 0x1c7   : > { %v3865_v48 = vadd.f32 %v1915_v32, %v1867_v44  ;;  %v1820_v51 = vadd.f32 %v1819_v46, %v1771_v47 }
 0x1cc   : > { %v1868_v52 = vpop.f32.mrf.mxu2  ;;  %v1929_v56 = vpop.f32.mrf.mxu0 }
 0x1cd   : > { %v1917_v55 = vpop.f32.mrf.mxu3  ;;  %v1869_v31 = vadd.f32 %v1868_v52, %v1820_v51  ;;  %v1978_v50 = vpop.f32.mrf.mxu1  ;;  %v1930_v49 = vadd.f32 %v1929_v56, %v3767_v1 }
 0x1cf   : > { %v3867_v57 = vadd.f32 %v1917_v55, %v1869_v31  ;;  %v1979_v53 = vadd.f32 %v1978_v50, %v1930_v49 }
 0x1d4   : > { %v2027_v59 = vpop.f32.mrf.mxu2  ;;  %v1931_v0 = vpop.f32.mrf.mxu0 }
 0x1d5   : > { %v2076_v62 = vpop.f32.mrf.mxu3  ;;  %v1980_v3 = vpop.f32.mrf.mxu1  ;;  %v1932_v4 = vadd.f32 %v1931_v0, %v3778_v24  ;;  %v2028_v54 = vadd.f32 %v2027_v59, %v1979_v53 }
 0x1d7   : > { %v1981_v60 = vadd.f32 %v1980_v3, %v1932_v4  ;;  %v2077_v12 = vadd.f32 %v2076_v62, %v2028_v54 }
 0x1dc   : > { %v2029_v7 = vpop.f32.mrf.mxu2  ;;  %v1934_v10 = vpop.f32.mrf.mxu0 }
 0x1dd   : > { %v2078_v8 = vpop.f32.mrf.mxu3  ;;  %v2030_v61 = vadd.f32 %v2029_v7, %v1981_v60  ;;  %v1983_v11 = vpop.f32.mrf.mxu1  ;;  %v1935_v24 = vadd.f32 %v1934_v10, %v3781_v35 }
 0x1df   : > { %v2079_v63 = vadd.f32 %v2078_v8, %v2030_v61  ;;  %v1984_v20 = vadd.f32 %v1983_v11, %v1935_v24 }
 0x1e1   : > { %v3226_v14 = vpack.c.bf16 %v2079_v63, %v2077_v12 }
 0x1e3   : > { %3227 = vst [vmem:[%s3872_s20] sm:$0xff] %v3226_v14  }
 0x1e4   : > { %v2032_v1 = vpop.f32.mrf.mxu2  ;;  %v1936_v16 = vpop.f32.mrf.mxu0 }
 0x1e5   : > { %v2081_v15 = vpop.f32.mrf.mxu3  ;;  %v1985_v18 = vpop.f32.mrf.mxu1  ;;  %v1937_v21 = vadd.f32 %v1936_v16, %v3792_v58  ;;  %v2033_v23 = vadd.f32 %v2032_v1, %v1984_v20 }
 0x1e7   : > { %v1986_v25 = vadd.f32 %v1985_v18, %v1937_v21  ;;  %v2082_v19 = vadd.f32 %v2081_v15, %v2033_v23 }
 0x1ec   : > { %v2034_v26 = vpop.f32.mrf.mxu2  ;;  %v1939_v33 = vpop.f32.mrf.mxu0 }
 0x1ed   : > { %v2083_v17 = vpop.f32.mrf.mxu3  ;;  %v2035_v27 = vadd.f32 %v2034_v26, %v1986_v25  ;;  %v1988_v34 = vpop.f32.mrf.mxu1  ;;  %v1940_v35 = vadd.f32 %v1939_v33, %v3795_v5 }
 0x1ef   : > { %v2084_v30 = vadd.f32 %v2083_v17, %v2035_v27  ;;  %v1989_v42 = vadd.f32 %v1988_v34, %v1940_v35 }
 0x1f1   : > { %v3231_v37 = vpack.c.bf16 %v2084_v30, %v2082_v19 }
 0x1f3   : > { %3263 = vst [vmem:[%s3872_s20 + $0x8] sm:$0xff] %v3231_v37  }
 0x1f4   : > { %v2037_v38 = vpop.f32.mrf.mxu2  ;;  %v1941_v28 = vpop.f32.mrf.mxu0 }
 0x1f5   : > { %v2086_v22 = vpop.f32.mrf.mxu3  ;;  %v1990_v41 = vpop.f32.mrf.mxu1  ;;  %v1942_v58 = vadd.f32 %v1941_v28, %v3806_v29  ;;  %v2038_v32 = vadd.f32 %v2037_v38, %v1989_v42 }
 0x1f7   : > { %v1991_v44 = vadd.f32 %v1990_v41, %v1942_v58  ;;  %v2087_v55 = vadd.f32 %v2086_v22, %v2038_v32 }
 0x1fc   : > { %v2039_v45 = vpop.f32.mrf.mxu2  ;;  %v1944_v51 = vpop.f32.mrf.mxu0 }
 0x1fd   : > { %v2088_v46 = vpop.f32.mrf.mxu3  ;;  %v2040_v47 = vadd.f32 %v2039_v45, %v1991_v44  ;;  %v1993_v52 = vpop.f32.mrf.mxu1  ;;  %v1945_v5 = vadd.f32 %v1944_v51, %v3809_v39 }
 0x1ff   : > { %v2089_v31 = vadd.f32 %v2088_v46, %v2040_v47  ;;  %v1994_v0 = vadd.f32 %v1993_v52, %v1945_v5 }
 0x201   : > { %v3236_v56 = vpack.c.bf16 %v2089_v31, %v2087_v55 }
 0x203   : > { %3264 = vst [vmem:[%s3872_s20 + $0x10] sm:$0xff] %v3236_v56  }
 0x204   : > { %v2042_v50 = vpop.f32.mrf.mxu2  ;;  %v1946_v62 = vpop.f32.mrf.mxu0 }
 0x205   : > { %v2091_v59 = vpop.f32.mrf.mxu3  ;;  %v1995_v49 = vpop.f32.mrf.mxu1  ;;  %v1947_v29 = vadd.f32 %v1946_v62, %v3820_v2  ;;  %v2043_v3 = vadd.f32 %v2042_v50, %v1994_v0 }
 0x207   : > { %v1996_v4 = vadd.f32 %v1995_v49, %v1947_v29  ;;  %v2092_v61 = vadd.f32 %v2091_v59, %v2043_v3 }
 0x20c   : > { %v2044_v53 = vpop.f32.mrf.mxu2  ;;  %v1949_v7 = vpop.f32.mrf.mxu0 }
 0x20d   : > { %v2093_v54 = vpop.f32.mrf.mxu3  ;;  %v2045_v60 = vadd.f32 %v2044_v53, %v1996_v4  ;;  %v1998_v8 = vpop.f32.mrf.mxu1  ;;  %v1950_v39 = vadd.f32 %v1949_v7, %v3823_v9 }
 0x20f   : > { %v2094_v10 = vadd.f32 %v2093_v54, %v2045_v60  ;;  %v1999_v15 = vadd.f32 %v1998_v8, %v1950_v39 }
 0x211   : > { %v3241_v11 = vpack.c.bf16 %v2094_v10, %v2092_v61 }
 0x213   : > { %3265 = vst [vmem:[%s3872_s20 + $0x18] sm:$0xff] %v3241_v11  }
 0x214   : > { %v2047_v12 = vpop.f32.mrf.mxu2  ;;  %v1951_v14 = vpop.f32.mrf.mxu0 }
 0x215   : > { %v2096_v63 = vpop.f32.mrf.mxu3  ;;  %v2000_v1 = vpop.f32.mrf.mxu1  ;;  %v1952_v2 = vadd.f32 %v1951_v14, %v3834_v36  ;;  %v2048_v24 = vadd.f32 %v2047_v12, %v1999_v15 }
 0x217   : > { %v2001_v16 = vadd.f32 %v2000_v1, %v1952_v2  ;;  %v2097_v26 = vadd.f32 %v2096_v63, %v2048_v24 }
 0x21c   : > { %v2049_v18 = vpop.f32.mrf.mxu2  ;;  %v1954_v23 = vpop.f32.mrf.mxu0 }
 0x21d   : > { %v2098_v21 = vpop.f32.mrf.mxu3  ;;  %v2050_v20 = vadd.f32 %v2049_v18, %v2001_v16  ;;  %v2003_v25 = vpop.f32.mrf.mxu1  ;;  %v1955_v9 = vadd.f32 %v1954_v23, %v3837_v43 }
 0x21f   : > { %v2099_v17 = vadd.f32 %v2098_v21, %v2050_v20  ;;  %v2004_v37 = vadd.f32 %v2003_v25, %v1955_v9 }
 0x221   : > { %v3246_v27 = vpack.c.bf16 %v2099_v17, %v2097_v26 }
 0x223   : > { %3266 = vst [vmem:[%s3872_s20 + $0x20] sm:$0xff] %v3246_v27  }
 0x224   : > { %v2052_v33 = vpop.f32.mrf.mxu2  ;;  %v1956_v19 = vpop.f32.mrf.mxu0 }
 0x225   : > { %v2101_v34 = vpop.f32.mrf.mxu3  ;;  %v2005_v30 = vpop.f32.mrf.mxu1  ;;  %v1957_v36 = vadd.f32 %v1956_v19, %v3848_v6  ;;  %v2053_v38 = vadd.f32 %v2052_v33, %v2004_v37 }
 0x227   : > { %v2006_v22 = vadd.f32 %v2005_v30, %v1957_v36  ;;  %v2102_v32 = vadd.f32 %v2101_v34, %v2053_v38 }
 0x22c   : > { %v2054_v35 = vpop.f32.mrf.mxu2  ;;  %v1959_v58 = vpop.f32.mrf.mxu0 }
 0x22d   : > { %v2103_v28 = vpop.f32.mrf.mxu3  ;;  %v2055_v41 = vadd.f32 %v2054_v35, %v2006_v22  ;;  %v2008_v42 = vpop.f32.mrf.mxu1  ;;  %v1960_v43 = vadd.f32 %v1959_v58, %v3851_v13 }
 0x22f   : > { %v2104_v44 = vadd.f32 %v2103_v28, %v2055_v41  ;;  %v2009_v55 = vadd.f32 %v2008_v42, %v1960_v43 }
 0x231   : > { %v3251_v45 = vpack.c.bf16 %v2104_v44, %v2102_v32 }
 0x233   : > { %3267 = vst [vmem:[%s3872_s20 + $0x28] sm:$0xff] %v3251_v45  }
 0x234   : > { %v2057_v46 = vpop.f32.mrf.mxu2  ;;  %v1961_v51 = vpop.f32.mrf.mxu0 }
 0x235   : > { %v2106_v47 = vpop.f32.mrf.mxu3  ;;  %v2010_v52 = vpop.f32.mrf.mxu1  ;;  %v1962_v6 = vadd.f32 %v1961_v51, %v3862_v40  ;;  %v2058_v31 = vadd.f32 %v2057_v46, %v2009_v55 }
 0x237   : > { %v2011_v56 = vadd.f32 %v2010_v52, %v1962_v6  ;;  %v2107_v49 = vadd.f32 %v2106_v47, %v2058_v31 }
 0x23c   : > { %v2059_v50 = vpop.f32.mrf.mxu2  ;;  %v1964_v62 = vpop.f32.mrf.mxu0 }
 0x23d   : > { %v2108_v59 = vpop.f32.mrf.mxu3  ;;  %v2060_v5 = vadd.f32 %v2059_v50, %v2011_v56  ;;  %v2013_v0 = vpop.f32.mrf.mxu1  ;;  %v1965_v53 = vadd.f32 %v1964_v62, %v3865_v48 }
 0x23f   : > { %v2109_v29 = vadd.f32 %v2108_v59, %v2060_v5  ;;  %v2014_v60 = vadd.f32 %v2013_v0, %v1965_v53 }
 0x241   : > { %v3256_v3 = vpack.c.bf16 %v2109_v29, %v2107_v49 }
 0x243   : > { %3268 = vst [vmem:[%s3872_s20 + $0x30] sm:$0xff] %v3256_v3  }
 0x244   : > { %v2062_v4 = vpop.f32.mrf.mxu2  ;;  %v1966_v54 = vpop.f32.mrf.mxu0 }
 0x245   : > { %v2111_v13 = vpop.f32.mrf.mxu3  ;;  %v1967_v40 = vadd.f32 %v1966_v54, %v3867_v57  ;;  %v2015_v7 = vpop.f32.mrf.mxu1  ;;  %v2063_v8 = vadd.f32 %v2062_v4, %v2014_v60 }
 0x247   : > { %v2016_v61 = vadd.f32 %v2015_v7, %v1967_v40  ;;  %v2112_v12 = vadd.f32 %v2111_v13, %v2063_v8 }
 0x24c   : > { %v2064_v10 = vpop.f32.mrf.mxu2 }
 0x24d   : > { %v2065_v11 = vadd.f32 %v2064_v10, %v2016_v61  ;;  %v2113_v48 = vpop.f32.mrf.mxu3 }
 0x24f   : > { %v2114_v57 = vadd.f32 %v2113_v48, %v2065_v11 }
 0x251   : > { %v3261_v63 = vpack.c.bf16 %v2114_v57, %v2112_v12 }
 0x253   : > { %3269 = vst [vmem:[%s3872_s20 + $0x38] sm:$0xff] %v3261_v63  }
 0x254   : > { %3423 = shalt.err (!%p3420_p10)
}
 0x255   : > { %s3473_s5 = smov 64   ;;  %s3474_s6 = smov 4  }
 0x256   : > { %3279 = dma.vmem_to_hbm [thread:$0]  (%p3557_p7), %s2162_s21, 1024, %s2164_s22, %s2149_s13, %s3473_s5, %s3473_s5, %s3474_s6  }
 0x257 PF: > { %s2178_s7 = sand.u32 1, %s3454_s9   ;;  %p3938_p12 = scmp.ge.s32.totalorder %s3466_s12, 2 }
 0x258   : > { %s2179_s17 = scalar_lea.sflag [#allocation4], %s2178_s7 }
 0x259   : > { %p3290_p13 = pnand %p3938_p12, %p3525_p6 }
 0x25b   : > { %p3291_p0 = pneg %p3290_p13 }
 0x25d   : > { %3449 = dma.done.wait (%p3291_p0), %s2179_s17, 1024  }
 0x25e   : > { %3451 = vsyncadd (%p3291_p0), %s2179_s17, 4294966272  ;;  %p16_p3 = scmp.ge.s32.totalorder %s3543_s23, 4   ;;  %s3939_s9 = smov %s3458_s10 }
 0x25f   : > { %s3940_s10 = smov %s3462_s11  ;;  %s3941_s11 = smov %s3553_s28 }
 0x260   : > { %s3942_s12 = smov %s3543_s23  ;;  %18 = sbr.rel (!%p16_p3) target bundleno = 6 (0x6), region = 77 }
 0x265   :  { %2185 = vsyncpa [#allocation3], 1 }
 0x266   :  { %2187 = vsyncpa [#allocation3 + $0x1], 1 }
 0x267   :  { %2188 = vsyncpa [#allocation6], 1 }
 0x268   :  { %2189 = vsyncpa [#allocation4], 1 }
 0x269   :  { %2191 = vsyncpa [#allocation4 + $0x1], 1 }

</bundles_post_ra>
